<compile_context>
chip_gen: v6e
topology: v6e:2x2x1
jax: 0.10.0
libtpu: 0.0.40
codegen_flags: <defaults>
</compile_context>

<pallas_src>
import functools

import jax
import jax.numpy as jnp
from jax.experimental import pallas as pl
from jax.experimental.pallas import tpu as pltpu


_LAYER_ORDER = ("enc_1", "enc_2", "enc_3", "z_layer",
                "dec_1", "dec_2", "dec_3", "x_bar_layer")


def _round_up(v, m):
    return ((v + m - 1) // m) * m


def _vmem_bytes(shape, dtype):
    """VMEM footprint of a 2-D array after (8, 128) tile padding."""
    rows = _round_up(max(shape[0], 1), 8)
    cols = _round_up(max(shape[1], 1), 128)
    return rows * cols * jnp.dtype(dtype).itemsize


def _ae_kernel(
    x_ref,
    we1, be1, we2, be2, we3, be3, wz, bz,
    wd1, bd1, wd2, bd2, wd3, bd3, wxb, bxb,
    out_ref,
    *, pad_cols,
):
    """Fused AE forward for one batch tile.

    All matmuls hit the MXU with f32 accumulation; bias-add / ReLU run on the
    VPU.  The five result tensors (x_bar, h1, h2, h3, z) are concatenated into
    a single lane-dense slab so the tile is written with one wide unmasked
    store instead of five narrow masked stores.
    """

    def linear(a, w_ref, b_ref, relu):
        w = w_ref[...]
        # Feed the MXU in the weights' dtype (bf16 weights -> full-rate bf16
        # MXU passes on v6e/v7x).  Accumulate in f32 either way.
        y = jnp.dot(a.astype(w.dtype), w, preferred_element_type=jnp.float32)
        y = y + b_ref[...].astype(jnp.float32)   # (1, out) broadcasts over rows
        if relu:
            y = jnp.maximum(y, 0.0)
        return y

    x = x_ref[...].astype(jnp.float32)

    h1 = linear(x, we1, be1, True)
    h2 = linear(h1, we2, be2, True)
    h3 = linear(h2, we3, be3, True)
    z = linear(h3, wz, bz, False)
    d1 = linear(z, wd1, bd1, True)
    d2 = linear(d1, wd2, bd2, True)
    d3 = linear(d2, wd3, bd3, True)
    x_bar = linear(d3, wxb, bxb, False)

    pieces = [x_bar, h1, h2, h3, z]
    if pad_cols:
        pieces.append(jnp.zeros((x_bar.shape[0], pad_cols), jnp.float32))
    out_ref[...] = jnp.concatenate(pieces, axis=-1).astype(out_ref.dtype)


def ae_forward(x, params, *, tm=None, param_dtype=None):
    """Run the fused AE kernel.

    x:           [N, n_input] float32
    params:      dict name -> (W[in, out], b[1, out]);   y = x @ W + b
    tm:          batch-tile rows; None -> auto (large, VMEM-budgeted, >=2 steps)
    param_dtype: optional dtype for the weights/biases passed to the kernel
                 (e.g. jnp.bfloat16 on v6e/v7x).  Accumulation stays f32.
    returns (x_bar, enc_h1, enc_h2, enc_h3, z) in float32, matching the torch
    module's output order.
    """
    N, n_input = x.shape

    wb = []
    for name in _LAYER_ORDER:
        w, b = params[name]
        if param_dtype is not None:
            w = w.astype(param_dtype)
            b = b.astype(param_dtype)
        wb += [w, b]

    n_enc_1 = params["enc_1"][0].shape[1]
    n_enc_2 = params["enc_2"][0].shape[1]
    n_enc_3 = params["enc_3"][0].shape[1]
    n_z = params["z_layer"][0].shape[1]

    # Packed, lane-dense output slab: [x_bar | h1 | h2 | h3 | z | zero-pad].
    out_widths = (n_input, n_enc_1, n_enc_2, n_enc_3, n_z)
    d_total = sum(out_widths)
    d_packed = _round_up(d_total, 128)
    pad_cols = d_packed - d_total

    # ---- VMEM accounting (used both for the tile choice and the limit) ----
    weight_vmem = sum(_vmem_bytes(a.shape, a.dtype) for a in wb)
    layer_out_dims = [params[name][0].shape[1] for name in _LAYER_ORDER]
    act_width = (_round_up(n_input, 128)
                 + sum(_round_up(d, 128) for d in layer_out_dims)
                 + d_packed)

    def vmem_need(t):
        io = 2 * (_vmem_bytes((t, n_input), jnp.float32)      # x tile, 2-buf
                  + _vmem_bytes((t, d_packed), jnp.float32))   # out tile, 2-buf
        acts = _round_up(t, 8) * act_width * 4                 # f32 intermediates
        # Weights counted twice: conservative, covers the default-buffered
        # fallback path as well as the single-buffered one.
        return 2 * weight_vmem + io + acts + (2 << 20)

    if tm is None:
        if N <= 8:
            tm = 8
        else:
            # Large tile (<=512 rows) but at least 2 grid steps when the batch
            # allows it, so both v7x TensorCores get work.
            tm = min(512, _round_up(pl.cdiv(N, 2), 8))
        # Shrink until the footprint fits a v7x-safe budget (64 MiB physical).
        while tm > 8 and vmem_need(tm) > (44 << 20):
            tm = max(8, _round_up(tm // 2, 8))

    vmem_limit = int(min(max(vmem_need(tm), 32 << 20), 56 << 20))

    # ---- batch padding so any N works with the chosen tile ----
    n_pad = (-N) % tm
    x_in = jnp.pad(x, ((0, n_pad), (0, 0))) if n_pad else x
    n_rows = N + n_pad
    grid = (n_rows // tm,)

    x_spec = pl.BlockSpec((tm, n_input), lambda i: (i, 0))
    out_spec = pl.BlockSpec((tm, d_packed), lambda i: (i, 0))
    out_shape = jax.ShapeDtypeStruct((n_rows, d_packed), jnp.float32)

    # Advisory cost estimate so XLA schedules the custom call sensibly.
    flops = 2 * N * sum(w_.shape[0] * w_.shape[1]
                        for w_, _ in (params[n] for n in _LAYER_ORDER))
    bytes_accessed = (x.size * x.dtype.itemsize
                      + sum(a.size * a.dtype.itemsize for a in wb)
                      + n_rows * d_packed * 4)
    cost = pl.CostEstimate(flops=flops, transcendentals=0,
                           bytes_accessed=bytes_accessed)

    def _build(single_buffer_params):
        if single_buffer_params:
            # Weights/biases are grid-invariant (index_map == (0, 0) every
            # step): a single VMEM buffer is enough -> halves weight VMEM.
            pmode = pl.Buffered(1)
            param_specs = [
                pl.BlockSpec(a.shape, lambda i: (0, 0), pipeline_mode=pmode)
                for a in wb
            ]
        else:
            param_specs = [pl.BlockSpec(a.shape, lambda i: (0, 0)) for a in wb]
        return pl.pallas_call(
            functools.partial(_ae_kernel, pad_cols=pad_cols),
            out_shape=out_shape,
            grid_spec=pltpu.PrefetchScalarGridSpec(
                num_scalar_prefetch=0,
                grid=grid,
                in_specs=[x_spec] + param_specs,
                out_specs=out_spec,
            ),
            compiler_params=pltpu.CompilerParams(
                dimension_semantics=("parallel",),
                vmem_limit_bytes=vmem_limit,
            ),
            cost_estimate=cost,
        )

    try:
        packed = _build(True)(x_in, *wb)
    except Exception:
        # Single-buffered (Buffered(1)) grid-invariant operands are not
        # supported by every jax build; fall back to default buffering
        # (semantics identical, just 2x weight VMEM).
        packed = _build(False)(x_in, *wb)

    # Slice the lane-dense slab back into the five torch-ordered outputs.
    outs = []
    off = 0
    for w_ in out_widths:
        outs.append(packed[:N, off:off + w_])
        off += w_
    return tuple(outs)


def _init_params(key, n_enc_1, n_enc_2, n_enc_3, n_dec_1, n_dec_2, n_dec_3,
                 n_input, n_z):
    """Deterministic synthetic parameters (shapes match the torch module)."""
    dims = {
        "enc_1": (n_input, n_enc_1),
        "enc_2": (n_enc_1, n_enc_2),
        "enc_3": (n_enc_2, n_enc_3),
        "z_layer": (n_enc_3, n_z),
        "dec_1": (n_z, n_dec_1),
        "dec_2": (n_dec_1, n_dec_2),
        "dec_3": (n_dec_2, n_dec_3),
        "x_bar_layer": (n_dec_3, n_input),
    }
    params = {}
    for name, (din, dout) in dims.items():
        key, kw, kb = jax.random.split(key, 3)
        bound = 1.0 / jnp.sqrt(jnp.float32(din))  # torch Linear default init range
        w = jax.random.uniform(kw, (din, dout), jnp.float32, -bound, bound)
        b = jax.random.uniform(kb, (1, dout), jnp.float32, -bound, bound)
        params[name] = (w, b)
    return params


def _ae_reference(x, params):
    """Plain-JAX reference of the torch forward pass."""
    def lin(a, name, relu):
        w, b = params[name]
        y = a @ w + b
        return jnp.maximum(y, 0.0) if relu else y

    h1 = lin(x, "enc_1", True)
    h2 = lin(h1, "enc_2", True)
    h3 = lin(h2, "enc_3", True)
    z = lin(h3, "z_layer", False)
    d1 = lin(z, "dec_1", True)
    d2 = lin(d1, "dec_2", True)
    d3 = lin(d2, "dec_3", True)
    x_bar = lin(d3, "x_bar_layer", False)
    return x_bar, h1, h2, h3, z


if __name__ == "__main__":
    key = jax.random.PRNGKey(0)
    key, kx, kp = jax.random.split(key, 3)

    # Small shapes consistent with the module's constructor arguments.
    N = 16          # batch (rows of x)
    n_input = 16
    n_enc_1, n_enc_2, n_enc_3 = 32, 32, 16
    n_z = 8
    n_dec_1, n_dec_2, n_dec_3 = 16, 32, 32

    x = jax.random.normal(kx, (N, n_input), jnp.float32)
    params = _init_params(kp, n_enc_1, n_enc_2, n_enc_3,
                          n_dec_1, n_dec_2, n_dec_3, n_input, n_z)

    refs = _ae_reference(x, params)

    # f32 path: bit-for-bit same math as before -> tight tolerance.
    outs = ae_forward(x, params)
    outs = jax.block_until_ready(outs)
    for o, r in zip(outs, refs):
        assert o.shape == r.shape and o.dtype == r.dtype
        assert jnp.allclose(o, r, atol=1e-5, rtol=1e-5)

    # bf16-weight path (full-rate MXU on v6e/v7x): looser tolerance.
    outs_bf16 = ae_forward(x, params, param_dtype=jnp.bfloat16)
    outs_bf16 = jax.block_until_ready(outs_bf16)
    for o, r in zip(outs_bf16, refs):
        assert o.shape == r.shape
        assert bool(jnp.all(jnp.isfinite(o)))
        assert jnp.allclose(o, r, atol=2.5e-1, rtol=2.5e-1)

    print("KERNEL_OK")
</pallas_src>

<mosaic_0001>
module attributes {stable_mosaic.version = 11 : i64} {
  func.func @_ae_kernel(%arg0: i32, %arg1: memref<8x16xf32, #tpu.memory_space<vmem>>, %arg2: memref<16x32xf32, #tpu.memory_space<vmem>>, %arg3: memref<1x32xf32, #tpu.memory_space<vmem>>, %arg4: memref<32x32xf32, #tpu.memory_space<vmem>>, %arg5: memref<1x32xf32, #tpu.memory_space<vmem>>, %arg6: memref<32x16xf32, #tpu.memory_space<vmem>>, %arg7: memref<1x16xf32, #tpu.memory_space<vmem>>, %arg8: memref<16x8xf32, #tpu.memory_space<vmem>>, %arg9: memref<1x8xf32, #tpu.memory_space<vmem>>, %arg10: memref<8x16xf32, #tpu.memory_space<vmem>>, %arg11: memref<1x16xf32, #tpu.memory_space<vmem>>, %arg12: memref<16x32xf32, #tpu.memory_space<vmem>>, %arg13: memref<1x32xf32, #tpu.memory_space<vmem>>, %arg14: memref<32x32xf32, #tpu.memory_space<vmem>>, %arg15: memref<1x32xf32, #tpu.memory_space<vmem>>, %arg16: memref<32x16xf32, #tpu.memory_space<vmem>>, %arg17: memref<1x16xf32, #tpu.memory_space<vmem>>, %arg18: memref<8x128xf32, #tpu.memory_space<vmem>>) attributes {dimension_semantics = [#tpu.dimension_semantics<parallel>], iteration_bounds = array<i64: 2>, scalar_prefetch = 0 : i64, scratch_operands = 0 : i64, tpu.core_type = #tpu.core_type<tc>, window_params = [{transform_indices = @transform_0, window_bounds = array<i64: 8, 16>}, {pipeline_mode = #tpu.pipeline_mode<synchronous>, transform_indices = @transform_1, window_bounds = array<i64: 16, 32>}, {pipeline_mode = #tpu.pipeline_mode<synchronous>, transform_indices = @transform_2, window_bounds = array<i64: 1, 32>}, {pipeline_mode = #tpu.pipeline_mode<synchronous>, transform_indices = @transform_3, window_bounds = array<i64: 32, 32>}, {pipeline_mode = #tpu.pipeline_mode<synchronous>, transform_indices = @transform_4, window_bounds = array<i64: 1, 32>}, {pipeline_mode = #tpu.pipeline_mode<synchronous>, transform_indices = @transform_5, window_bounds = array<i64: 32, 16>}, {pipeline_mode = #tpu.pipeline_mode<synchronous>, transform_indices = @transform_6, window_bounds = array<i64: 1, 16>}, {pipeline_mode = #tpu.pipeline_mode<synchronous>, transform_indices = @transform_7, window_bounds = array<i64: 16, 8>}, {pipeline_mode = #tpu.pipeline_mode<synchronous>, transform_indices = @transform_8, window_bounds = array<i64: 1, 8>}, {pipeline_mode = #tpu.pipeline_mode<synchronous>, transform_indices = @transform_9, window_bounds = array<i64: 8, 16>}, {pipeline_mode = #tpu.pipeline_mode<synchronous>, transform_indices = @transform_10, window_bounds = array<i64: 1, 16>}, {pipeline_mode = #tpu.pipeline_mode<synchronous>, transform_indices = @transform_11, window_bounds = array<i64: 16, 32>}, {pipeline_mode = #tpu.pipeline_mode<synchronous>, transform_indices = @transform_12, window_bounds = array<i64: 1, 32>}, {pipeline_mode = #tpu.pipeline_mode<synchronous>, transform_indices = @transform_13, window_bounds = array<i64: 32, 32>}, {pipeline_mode = #tpu.pipeline_mode<synchronous>, transform_indices = @transform_14, window_bounds = array<i64: 1, 32>}, {pipeline_mode = #tpu.pipeline_mode<synchronous>, transform_indices = @transform_15, window_bounds = array<i64: 32, 16>}, {pipeline_mode = #tpu.pipeline_mode<synchronous>, transform_indices = @transform_16, window_bounds = array<i64: 1, 16>}, {transform_indices = @transform_17, window_bounds = array<i64: 8, 128>}]} {
    %c0 = arith.constant 0 : index
    %c0_0 = arith.constant 0 : index
    %0 = vector.load %arg1[%c0, %c0_0] : memref<8x16xf32, #tpu.memory_space<vmem>>, vector<8x16xf32>
    %c0_1 = arith.constant 0 : index
    %c0_2 = arith.constant 0 : index
    %1 = vector.load %arg2[%c0_1, %c0_2] : memref<16x32xf32, #tpu.memory_space<vmem>>, vector<16x32xf32>
    %cst = arith.constant dense<0.000000e+00> : vector<8x32xf32>
    %2 = tpu.matmul %0, %1, %cst {dimension_numbers = #tpu.dot_dimension_numbers<[1], [0], [0], [1], [0, 0, 1, 1], [], []>} : vector<8x16xf32>, vector<16x32xf32>, vector<8x32xf32> -> vector<8x32xf32>
    %c0_3 = arith.constant 0 : index
    %c0_4 = arith.constant 0 : index
    %3 = vector.load %arg3[%c0_3, %c0_4] : memref<1x32xf32, #tpu.memory_space<vmem>>, vector<1x32xf32>
    %4 = vector.broadcast %3 : vector<1x32xf32> to vector<8x32xf32>
    %5 = arith.addf %2, %4 : vector<8x32xf32>
    %cst_5 = arith.constant 0.000000e+00 : f32
    %6 = vector.broadcast %cst_5 : f32 to vector<8x32xf32>
    %7 = arith.maximumf %5, %6 : vector<8x32xf32>
    %c0_6 = arith.constant 0 : index
    %c0_7 = arith.constant 0 : index
    %8 = vector.load %arg4[%c0_6, %c0_7] : memref<32x32xf32, #tpu.memory_space<vmem>>, vector<32x32xf32>
    %cst_8 = arith.constant dense<0.000000e+00> : vector<8x32xf32>
    %9 = tpu.matmul %7, %8, %cst_8 {dimension_numbers = #tpu.dot_dimension_numbers<[1], [0], [0], [1], [0, 0, 1, 1], [], []>} : vector<8x32xf32>, vector<32x32xf32>, vector<8x32xf32> -> vector<8x32xf32>
    %c0_9 = arith.constant 0 : index
    %c0_10 = arith.constant 0 : index
    %10 = vector.load %arg5[%c0_9, %c0_10] : memref<1x32xf32, #tpu.memory_space<vmem>>, vector<1x32xf32>
    %11 = vector.broadcast %10 : vector<1x32xf32> to vector<8x32xf32>
    %12 = arith.addf %9, %11 : vector<8x32xf32>
    %cst_11 = arith.constant 0.000000e+00 : f32
    %13 = vector.broadcast %cst_11 : f32 to vector<8x32xf32>
    %14 = arith.maximumf %12, %13 : vector<8x32xf32>
    %c0_12 = arith.constant 0 : index
    %c0_13 = arith.constant 0 : index
    %15 = vector.load %arg6[%c0_12, %c0_13] : memref<32x16xf32, #tpu.memory_space<vmem>>, vector<32x16xf32>
    %cst_14 = arith.constant dense<0.000000e+00> : vector<8x16xf32>
    %16 = tpu.matmul %14, %15, %cst_14 {dimension_numbers = #tpu.dot_dimension_numbers<[1], [0], [0], [1], [0, 0, 1, 1], [], []>} : vector<8x32xf32>, vector<32x16xf32>, vector<8x16xf32> -> vector<8x16xf32>
    %c0_15 = arith.constant 0 : index
    %c0_16 = arith.constant 0 : index
    %17 = vector.load %arg7[%c0_15, %c0_16] : memref<1x16xf32, #tpu.memory_space<vmem>>, vector<1x16xf32>
    %18 = vector.broadcast %17 : vector<1x16xf32> to vector<8x16xf32>
    %19 = arith.addf %16, %18 : vector<8x16xf32>
    %cst_17 = arith.constant 0.000000e+00 : f32
    %20 = vector.broadcast %cst_17 : f32 to vector<8x16xf32>
    %21 = arith.maximumf %19, %20 : vector<8x16xf32>
    %c0_18 = arith.constant 0 : index
    %c0_19 = arith.constant 0 : index
    %22 = vector.load %arg8[%c0_18, %c0_19] : memref<16x8xf32, #tpu.memory_space<vmem>>, vector<16x8xf32>
    %cst_20 = arith.constant dense<0.000000e+00> : vector<8x8xf32>
    %23 = tpu.matmul %21, %22, %cst_20 {dimension_numbers = #tpu.dot_dimension_numbers<[1], [0], [0], [1], [0, 0, 1, 1], [], []>} : vector<8x16xf32>, vector<16x8xf32>, vector<8x8xf32> -> vector<8x8xf32>
    %c0_21 = arith.constant 0 : index
    %c0_22 = arith.constant 0 : index
    %24 = vector.load %arg9[%c0_21, %c0_22] : memref<1x8xf32, #tpu.memory_space<vmem>>, vector<1x8xf32>
    %25 = vector.broadcast %24 : vector<1x8xf32> to vector<8x8xf32>
    %26 = arith.addf %23, %25 : vector<8x8xf32>
    %c0_23 = arith.constant 0 : index
    %c0_24 = arith.constant 0 : index
    %27 = vector.load %arg10[%c0_23, %c0_24] : memref<8x16xf32, #tpu.memory_space<vmem>>, vector<8x16xf32>
    %cst_25 = arith.constant dense<0.000000e+00> : vector<8x16xf32>
    %28 = tpu.matmul %26, %27, %cst_25 {dimension_numbers = #tpu.dot_dimension_numbers<[1], [0], [0], [1], [0, 0, 1, 1], [], []>} : vector<8x8xf32>, vector<8x16xf32>, vector<8x16xf32> -> vector<8x16xf32>
    %c0_26 = arith.constant 0 : index
    %c0_27 = arith.constant 0 : index
    %29 = vector.load %arg11[%c0_26, %c0_27] : memref<1x16xf32, #tpu.memory_space<vmem>>, vector<1x16xf32>
    %30 = vector.broadcast %29 : vector<1x16xf32> to vector<8x16xf32>
    %31 = arith.addf %28, %30 : vector<8x16xf32>
    %cst_28 = arith.constant 0.000000e+00 : f32
    %32 = vector.broadcast %cst_28 : f32 to vector<8x16xf32>
    %33 = arith.maximumf %31, %32 : vector<8x16xf32>
    %c0_29 = arith.constant 0 : index
    %c0_30 = arith.constant 0 : index
    %34 = vector.load %arg12[%c0_29, %c0_30] : memref<16x32xf32, #tpu.memory_space<vmem>>, vector<16x32xf32>
    %cst_31 = arith.constant dense<0.000000e+00> : vector<8x32xf32>
    %35 = tpu.matmul %33, %34, %cst_31 {dimension_numbers = #tpu.dot_dimension_numbers<[1], [0], [0], [1], [0, 0, 1, 1], [], []>} : vector<8x16xf32>, vector<16x32xf32>, vector<8x32xf32> -> vector<8x32xf32>
    %c0_32 = arith.constant 0 : index
    %c0_33 = arith.constant 0 : index
    %36 = vector.load %arg13[%c0_32, %c0_33] : memref<1x32xf32, #tpu.memory_space<vmem>>, vector<1x32xf32>
    %37 = vector.broadcast %36 : vector<1x32xf32> to vector<8x32xf32>
    %38 = arith.addf %35, %37 : vector<8x32xf32>
    %cst_34 = arith.constant 0.000000e+00 : f32
    %39 = vector.broadcast %cst_34 : f32 to vector<8x32xf32>
    %40 = arith.maximumf %38, %39 : vector<8x32xf32>
    %c0_35 = arith.constant 0 : index
    %c0_36 = arith.constant 0 : index
    %41 = vector.load %arg14[%c0_35, %c0_36] : memref<32x32xf32, #tpu.memory_space<vmem>>, vector<32x32xf32>
    %cst_37 = arith.constant dense<0.000000e+00> : vector<8x32xf32>
    %42 = tpu.matmul %40, %41, %cst_37 {dimension_numbers = #tpu.dot_dimension_numbers<[1], [0], [0], [1], [0, 0, 1, 1], [], []>} : vector<8x32xf32>, vector<32x32xf32>, vector<8x32xf32> -> vector<8x32xf32>
    %c0_38 = arith.constant 0 : index
    %c0_39 = arith.constant 0 : index
    %43 = vector.load %arg15[%c0_38, %c0_39] : memref<1x32xf32, #tpu.memory_space<vmem>>, vector<1x32xf32>
    %44 = vector.broadcast %43 : vector<1x32xf32> to vector<8x32xf32>
    %45 = arith.addf %42, %44 : vector<8x32xf32>
    %cst_40 = arith.constant 0.000000e+00 : f32
    %46 = vector.broadcast %cst_40 : f32 to vector<8x32xf32>
    %47 = arith.maximumf %45, %46 : vector<8x32xf32>
    %c0_41 = arith.constant 0 : index
    %c0_42 = arith.constant 0 : index
    %48 = vector.load %arg16[%c0_41, %c0_42] : memref<32x16xf32, #tpu.memory_space<vmem>>, vector<32x16xf32>
    %cst_43 = arith.constant dense<0.000000e+00> : vector<8x16xf32>
    %49 = tpu.matmul %47, %48, %cst_43 {dimension_numbers = #tpu.dot_dimension_numbers<[1], [0], [0], [1], [0, 0, 1, 1], [], []>} : vector<8x32xf32>, vector<32x16xf32>, vector<8x16xf32> -> vector<8x16xf32>
    %c0_44 = arith.constant 0 : index
    %c0_45 = arith.constant 0 : index
    %50 = vector.load %arg17[%c0_44, %c0_45] : memref<1x16xf32, #tpu.memory_space<vmem>>, vector<1x16xf32>
    %51 = vector.broadcast %50 : vector<1x16xf32> to vector<8x16xf32>
    %52 = arith.addf %49, %51 : vector<8x16xf32>
    %cst_46 = arith.constant 0.000000e+00 : f32
    %53 = vector.broadcast %cst_46 : f32 to vector<8x24xf32>
    %54 = tpu.concatenate %52, %7, %14, %21, %26, %53 in 1 : vector<8x16xf32>, vector<8x32xf32>, vector<8x32xf32>, vector<8x16xf32>, vector<8x8xf32>, vector<8x24xf32> -> vector<8x128xf32>
    %c0_47 = arith.constant 0 : index
    %c0_48 = arith.constant 0 : index
    %55 = vector.load %arg18[%c0_47, %c0_48] : memref<8x128xf32, #tpu.memory_space<vmem>>, vector<8x128xf32>
    tpu.vector_store %arg18[%c0_47, %c0_48], %54 {strides = array<i32>} : memref<8x128xf32, #tpu.memory_space<vmem>>, vector<8x128xf32>,
    return
  }
  func.func @transform_0(%arg0: i32) -> (i32, i32) {
    %c0_i32 = arith.constant 0 : i32
    %c0_i32_0 = arith.constant 0 : i32
    return %arg0, %c0_i32 : i32, i32
  }
  func.func @transform_1(%arg0: i32) -> (i32, i32) {
    %c0_i32 = arith.constant 0 : i32
    %c0_i32_0 = arith.constant 0 : i32
    %c0_i32_1 = arith.constant 0 : i32
    return %c0_i32, %c0_i32_0 : i32, i32
  }
  func.func @transform_2(%arg0: i32) -> (i32, i32) {
    %c0_i32 = arith.constant 0 : i32
    %c0_i32_0 = arith.constant 0 : i32
    %c0_i32_1 = arith.constant 0 : i32
    return %c0_i32, %c0_i32_0 : i32, i32
  }
  func.func @transform_3(%arg0: i32) -> (i32, i32) {
    %c0_i32 = arith.constant 0 : i32
    %c0_i32_0 = arith.constant 0 : i32
    %c0_i32_1 = arith.constant 0 : i32
    return %c0_i32, %c0_i32_0 : i32, i32
  }
  func.func @transform_4(%arg0: i32) -> (i32, i32) {
    %c0_i32 = arith.constant 0 : i32
    %c0_i32_0 = arith.constant 0 : i32
    %c0_i32_1 = arith.constant 0 : i32
    return %c0_i32, %c0_i32_0 : i32, i32
  }
  func.func @transform_5(%arg0: i32) -> (i32, i32) {
    %c0_i32 = arith.constant 0 : i32
    %c0_i32_0 = arith.constant 0 : i32
    %c0_i32_1 = arith.constant 0 : i32
    return %c0_i32, %c0_i32_0 : i32, i32
  }
  func.func @transform_6(%arg0: i32) -> (i32, i32) {
    %c0_i32 = arith.constant 0 : i32
    %c0_i32_0 = arith.constant 0 : i32
    %c0_i32_1 = arith.constant 0 : i32
    return %c0_i32, %c0_i32_0 : i32, i32
  }
  func.func @transform_7(%arg0: i32) -> (i32, i32) {
    %c0_i32 = arith.constant 0 : i32
    %c0_i32_0 = arith.constant 0 : i32
    %c0_i32_1 = arith.constant 0 : i32
    return %c0_i32, %c0_i32_0 : i32, i32
  }
  func.func @transform_8(%arg0: i32) -> (i32, i32) {
    %c0_i32 = arith.constant 0 : i32
    %c0_i32_0 = arith.constant 0 : i32
    %c0_i32_1 = arith.constant 0 : i32
    return %c0_i32, %c0_i32_0 : i32, i32
  }
  func.func @transform_9(%arg0: i32) -> (i32, i32) {
    %c0_i32 = arith.constant 0 : i32
    %c0_i32_0 = arith.constant 0 : i32
    %c0_i32_1 = arith.constant 0 : i32
    return %c0_i32, %c0_i32_0 : i32, i32
  }
  func.func @transform_10(%arg0: i32) -> (i32, i32) {
    %c0_i32 = arith.constant 0 : i32
    %c0_i32_0 = arith.constant 0 : i32
    %c0_i32_1 = arith.constant 0 : i32
    return %c0_i32, %c0_i32_0 : i32, i32
  }
  func.func @transform_11(%arg0: i32) -> (i32, i32) {
    %c0_i32 = arith.constant 0 : i32
    %c0_i32_0 = arith.constant 0 : i32
    %c0_i32_1 = arith.constant 0 : i32
    return %c0_i32, %c0_i32_0 : i32, i32
  }
  func.func @transform_12(%arg0: i32) -> (i32, i32) {
    %c0_i32 = arith.constant 0 : i32
    %c0_i32_0 = arith.constant 0 : i32
    %c0_i32_1 = arith.constant 0 : i32
    return %c0_i32, %c0_i32_0 : i32, i32
  }
  func.func @transform_13(%arg0: i32) -> (i32, i32) {
    %c0_i32 = arith.constant 0 : i32
    %c0_i32_0 = arith.constant 0 : i32
    %c0_i32_1 = arith.constant 0 : i32
    return %c0_i32, %c0_i32_0 : i32, i32
  }
  func.func @transform_14(%arg0: i32) -> (i32, i32) {
    %c0_i32 = arith.constant 0 : i32
    %c0_i32_0 = arith.constant 0 : i32
    %c0_i32_1 = arith.constant 0 : i32
    return %c0_i32, %c0_i32_0 : i32, i32
  }
  func.func @transform_15(%arg0: i32) -> (i32, i32) {
    %c0_i32 = arith.constant 0 : i32
    %c0_i32_0 = arith.constant 0 : i32
    %c0_i32_1 = arith.constant 0 : i32
    return %c0_i32, %c0_i32_0 : i32, i32
  }
  func.func @transform_16(%arg0: i32) -> (i32, i32) {
    %c0_i32 = arith.constant 0 : i32
    %c0_i32_0 = arith.constant 0 : i32
    %c0_i32_1 = arith.constant 0 : i32
    return %c0_i32, %c0_i32_0 : i32, i32
  }
  func.func @transform_17(%arg0: i32) -> (i32, i32) {
    %c0_i32 = arith.constant 0 : i32
    %c0_i32_0 = arith.constant 0 : i32
    return %arg0, %c0_i32 : i32, i32
  }
}

module attributes {stable_mosaic.version = 11 : i64} {
  func.func @_ae_kernel(%arg0: i32, %arg1: memref<8x16xf32, #tpu.memory_space<vmem>>, %arg2: memref<16x32xf32, #tpu.memory_space<vmem>>, %arg3: memref<1x32xf32, #tpu.memory_space<vmem>>, %arg4: memref<32x32xf32, #tpu.memory_space<vmem>>, %arg5: memref<1x32xf32, #tpu.memory_space<vmem>>, %arg6: memref<32x16xf32, #tpu.memory_space<vmem>>, %arg7: memref<1x16xf32, #tpu.memory_space<vmem>>, %arg8: memref<16x8xf32, #tpu.memory_space<vmem>>, %arg9: memref<1x8xf32, #tpu.memory_space<vmem>>, %arg10: memref<8x16xf32, #tpu.memory_space<vmem>>, %arg11: memref<1x16xf32, #tpu.memory_space<vmem>>, %arg12: memref<16x32xf32, #tpu.memory_space<vmem>>, %arg13: memref<1x32xf32, #tpu.memory_space<vmem>>, %arg14: memref<32x32xf32, #tpu.memory_space<vmem>>, %arg15: memref<1x32xf32, #tpu.memory_space<vmem>>, %arg16: memref<32x16xf32, #tpu.memory_space<vmem>>, %arg17: memref<1x16xf32, #tpu.memory_space<vmem>>, %arg18: memref<8x128xf32, #tpu.memory_space<vmem>>) attributes {dimension_semantics = [#tpu.dimension_semantics<parallel>], iteration_bounds = array<i64: 2>, scalar_prefetch = 0 : i64, scratch_operands = 0 : i64, tpu.core_type = #tpu.core_type<tc>, window_params = [{transform_indices = @transform_0, window_bounds = array<i64: 8, 16>}, {pipeline_mode = #tpu.pipeline_mode<synchronous>, transform_indices = @transform_1, window_bounds = array<i64: 16, 32>}, {pipeline_mode = #tpu.pipeline_mode<synchronous>, transform_indices = @transform_2, window_bounds = array<i64: 1, 32>}, {pipeline_mode = #tpu.pipeline_mode<synchronous>, transform_indices = @transform_3, window_bounds = array<i64: 32, 32>}, {pipeline_mode = #tpu.pipeline_mode<synchronous>, transform_indices = @transform_4, window_bounds = array<i64: 1, 32>}, {pipeline_mode = #tpu.pipeline_mode<synchronous>, transform_indices = @transform_5, window_bounds = array<i64: 32, 16>}, {pipeline_mode = #tpu.pipeline_mode<synchronous>, transform_indices = @transform_6, window_bounds = array<i64: 1, 16>}, {pipeline_mode = #tpu.pipeline_mode<synchronous>, transform_indices = @transform_7, window_bounds = array<i64: 16, 8>}, {pipeline_mode = #tpu.pipeline_mode<synchronous>, transform_indices = @transform_8, window_bounds = array<i64: 1, 8>}, {pipeline_mode = #tpu.pipeline_mode<synchronous>, transform_indices = @transform_9, window_bounds = array<i64: 8, 16>}, {pipeline_mode = #tpu.pipeline_mode<synchronous>, transform_indices = @transform_10, window_bounds = array<i64: 1, 16>}, {pipeline_mode = #tpu.pipeline_mode<synchronous>, transform_indices = @transform_11, window_bounds = array<i64: 16, 32>}, {pipeline_mode = #tpu.pipeline_mode<synchronous>, transform_indices = @transform_12, window_bounds = array<i64: 1, 32>}, {pipeline_mode = #tpu.pipeline_mode<synchronous>, transform_indices = @transform_13, window_bounds = array<i64: 32, 32>}, {pipeline_mode = #tpu.pipeline_mode<synchronous>, transform_indices = @transform_14, window_bounds = array<i64: 1, 32>}, {pipeline_mode = #tpu.pipeline_mode<synchronous>, transform_indices = @transform_15, window_bounds = array<i64: 32, 16>}, {pipeline_mode = #tpu.pipeline_mode<synchronous>, transform_indices = @transform_16, window_bounds = array<i64: 1, 16>}, {transform_indices = @transform_17, window_bounds = array<i64: 8, 128>}]} {
    %c0 = arith.constant 0 : index
    %c0_0 = arith.constant 0 : index
    %0 = vector.load %arg1[%c0, %c0_0] : memref<8x16xf32, #tpu.memory_space<vmem>>, vector<8x16xf32>
    %c0_1 = arith.constant 0 : index
    %c0_2 = arith.constant 0 : index
    %1 = vector.load %arg2[%c0_1, %c0_2] : memref<16x32xf32, #tpu.memory_space<vmem>>, vector<16x32xf32>
    %cst = arith.constant dense<0.000000e+00> : vector<8x32xf32>
    %2 = tpu.matmul %0, %1, %cst {dimension_numbers = #tpu.dot_dimension_numbers<[1], [0], [0], [1], [0, 0, 1, 1], [], []>} : vector<8x16xf32>, vector<16x32xf32>, vector<8x32xf32> -> vector<8x32xf32>
    %c0_3 = arith.constant 0 : index
    %c0_4 = arith.constant 0 : index
    %3 = vector.load %arg3[%c0_3, %c0_4] : memref<1x32xf32, #tpu.memory_space<vmem>>, vector<1x32xf32>
    %4 = vector.broadcast %3 : vector<1x32xf32> to vector<8x32xf32>
    %5 = arith.addf %2, %4 : vector<8x32xf32>
    %cst_5 = arith.constant 0.000000e+00 : f32
    %6 = vector.broadcast %cst_5 : f32 to vector<8x32xf32>
    %7 = arith.maximumf %5, %6 : vector<8x32xf32>
    %c0_6 = arith.constant 0 : index
    %c0_7 = arith.constant 0 : index
    %8 = vector.load %arg4[%c0_6, %c0_7] : memref<32x32xf32, #tpu.memory_space<vmem>>, vector<32x32xf32>
    %cst_8 = arith.constant dense<0.000000e+00> : vector<8x32xf32>
    %9 = tpu.matmul %7, %8, %cst_8 {dimension_numbers = #tpu.dot_dimension_numbers<[1], [0], [0], [1], [0, 0, 1, 1], [], []>} : vector<8x32xf32>, vector<32x32xf32>, vector<8x32xf32> -> vector<8x32xf32>
    %c0_9 = arith.constant 0 : index
    %c0_10 = arith.constant 0 : index
    %10 = vector.load %arg5[%c0_9, %c0_10] : memref<1x32xf32, #tpu.memory_space<vmem>>, vector<1x32xf32>
    %11 = vector.broadcast %10 : vector<1x32xf32> to vector<8x32xf32>
    %12 = arith.addf %9, %11 : vector<8x32xf32>
    %cst_11 = arith.constant 0.000000e+00 : f32
    %13 = vector.broadcast %cst_11 : f32 to vector<8x32xf32>
    %14 = arith.maximumf %12, %13 : vector<8x32xf32>
    %c0_12 = arith.constant 0 : index
    %c0_13 = arith.constant 0 : index
    %15 = vector.load %arg6[%c0_12, %c0_13] : memref<32x16xf32, #tpu.memory_space<vmem>>, vector<32x16xf32>
    %cst_14 = arith.constant dense<0.000000e+00> : vector<8x16xf32>
    %16 = tpu.matmul %14, %15, %cst_14 {dimension_numbers = #tpu.dot_dimension_numbers<[1], [0], [0], [1], [0, 0, 1, 1], [], []>} : vector<8x32xf32>, vector<32x16xf32>, vector<8x16xf32> -> vector<8x16xf32>
    %c0_15 = arith.constant 0 : index
    %c0_16 = arith.constant 0 : index
    %17 = vector.load %arg7[%c0_15, %c0_16] : memref<1x16xf32, #tpu.memory_space<vmem>>, vector<1x16xf32>
    %18 = vector.broadcast %17 : vector<1x16xf32> to vector<8x16xf32>
    %19 = arith.addf %16, %18 : vector<8x16xf32>
    %cst_17 = arith.constant 0.000000e+00 : f32
    %20 = vector.broadcast %cst_17 : f32 to vector<8x16xf32>
    %21 = arith.maximumf %19, %20 : vector<8x16xf32>
    %c0_18 = arith.constant 0 : index
    %c0_19 = arith.constant 0 : index
    %22 = vector.load %arg8[%c0_18, %c0_19] : memref<16x8xf32, #tpu.memory_space<vmem>>, vector<16x8xf32>
    %cst_20 = arith.constant dense<0.000000e+00> : vector<8x8xf32>
    %23 = tpu.matmul %21, %22, %cst_20 {dimension_numbers = #tpu.dot_dimension_numbers<[1], [0], [0], [1], [0, 0, 1, 1], [], []>} : vector<8x16xf32>, vector<16x8xf32>, vector<8x8xf32> -> vector<8x8xf32>
    %c0_21 = arith.constant 0 : index
    %c0_22 = arith.constant 0 : index
    %24 = vector.load %arg9[%c0_21, %c0_22] : memref<1x8xf32, #tpu.memory_space<vmem>>, vector<1x8xf32>
    %25 = vector.broadcast %24 : vector<1x8xf32> to vector<8x8xf32>
    %26 = arith.addf %23, %25 : vector<8x8xf32>
    %c0_23 = arith.constant 0 : index
    %c0_24 = arith.constant 0 : index
    %27 = vector.load %arg10[%c0_23, %c0_24] : memref<8x16xf32, #tpu.memory_space<vmem>>, vector<8x16xf32>
    %cst_25 = arith.constant dense<0.000000e+00> : vector<8x16xf32>
    %28 = tpu.matmul %26, %27, %cst_25 {dimension_numbers = #tpu.dot_dimension_numbers<[1], [0], [0], [1], [0, 0, 1, 1], [], []>} : vector<8x8xf32>, vector<8x16xf32>, vector<8x16xf32> -> vector<8x16xf32>
    %c0_26 = arith.constant 0 : index
    %c0_27 = arith.constant 0 : index
    %29 = vector.load %arg11[%c0_26, %c0_27] : memref<1x16xf32, #tpu.memory_space<vmem>>, vector<1x16xf32>
    %30 = vector.broadcast %29 : vector<1x16xf32> to vector<8x16xf32>
    %31 = arith.addf %28, %30 : vector<8x16xf32>
    %cst_28 = arith.constant 0.000000e+00 : f32
    %32 = vector.broadcast %cst_28 : f32 to vector<8x16xf32>
    %33 = arith.maximumf %31, %32 : vector<8x16xf32>
    %c0_29 = arith.constant 0 : index
    %c0_30 = arith.constant 0 : index
    %34 = vector.load %arg12[%c0_29, %c0_30] : memref<16x32xf32, #tpu.memory_space<vmem>>, vector<16x32xf32>
    %cst_31 = arith.constant dense<0.000000e+00> : vector<8x32xf32>
    %35 = tpu.matmul %33, %34, %cst_31 {dimension_numbers = #tpu.dot_dimension_numbers<[1], [0], [0], [1], [0, 0, 1, 1], [], []>} : vector<8x16xf32>, vector<16x32xf32>, vector<8x32xf32> -> vector<8x32xf32>
    %c0_32 = arith.constant 0 : index
    %c0_33 = arith.constant 0 : index
    %36 = vector.load %arg13[%c0_32, %c0_33] : memref<1x32xf32, #tpu.memory_space<vmem>>, vector<1x32xf32>
    %37 = vector.broadcast %36 : vector<1x32xf32> to vector<8x32xf32>
    %38 = arith.addf %35, %37 : vector<8x32xf32>
    %cst_34 = arith.constant 0.000000e+00 : f32
    %39 = vector.broadcast %cst_34 : f32 to vector<8x32xf32>
    %40 = arith.maximumf %38, %39 : vector<8x32xf32>
    %c0_35 = arith.constant 0 : index
    %c0_36 = arith.constant 0 : index
    %41 = vector.load %arg14[%c0_35, %c0_36] : memref<32x32xf32, #tpu.memory_space<vmem>>, vector<32x32xf32>
    %cst_37 = arith.constant dense<0.000000e+00> : vector<8x32xf32>
    %42 = tpu.matmul %40, %41, %cst_37 {dimension_numbers = #tpu.dot_dimension_numbers<[1], [0], [0], [1], [0, 0, 1, 1], [], []>} : vector<8x32xf32>, vector<32x32xf32>, vector<8x32xf32> -> vector<8x32xf32>
    %c0_38 = arith.constant 0 : index
    %c0_39 = arith.constant 0 : index
    %43 = vector.load %arg15[%c0_38, %c0_39] : memref<1x32xf32, #tpu.memory_space<vmem>>, vector<1x32xf32>
    %44 = vector.broadcast %43 : vector<1x32xf32> to vector<8x32xf32>
    %45 = arith.addf %42, %44 : vector<8x32xf32>
    %cst_40 = arith.constant 0.000000e+00 : f32
    %46 = vector.broadcast %cst_40 : f32 to vector<8x32xf32>
    %47 = arith.maximumf %45, %46 : vector<8x32xf32>
    %c0_41 = arith.constant 0 : index
    %c0_42 = arith.constant 0 : index
    %48 = vector.load %arg16[%c0_41, %c0_42] : memref<32x16xf32, #tpu.memory_space<vmem>>, vector<32x16xf32>
    %cst_43 = arith.constant dense<0.000000e+00> : vector<8x16xf32>
    %49 = tpu.matmul %47, %48, %cst_43 {dimension_numbers = #tpu.dot_dimension_numbers<[1], [0], [0], [1], [0, 0, 1, 1], [], []>} : vector<8x32xf32>, vector<32x16xf32>, vector<8x16xf32> -> vector<8x16xf32>
    %c0_44 = arith.constant 0 : index
    %c0_45 = arith.constant 0 : index
    %50 = vector.load %arg17[%c0_44, %c0_45] : memref<1x16xf32, #tpu.memory_space<vmem>>, vector<1x16xf32>
    %51 = vector.broadcast %50 : vector<1x16xf32> to vector<8x16xf32>
    %52 = arith.addf %49, %51 : vector<8x16xf32>
    %cst_46 = arith.constant 0.000000e+00 : f32
    %53 = vector.broadcast %cst_46 : f32 to vector<8x24xf32>
    %54 = tpu.concatenate %52, %7, %14, %21, %26, %53 in 1 : vector<8x16xf32>, vector<8x32xf32>, vector<8x32xf32>, vector<8x16xf32>, vector<8x8xf32>, vector<8x24xf32> -> vector<8x128xf32>
    %c0_47 = arith.constant 0 : index
    %c0_48 = arith.constant 0 : index
    %55 = vector.load %arg18[%c0_47, %c0_48] : memref<8x128xf32, #tpu.memory_space<vmem>>, vector<8x128xf32>
    tpu.vector_store %arg18[%c0_47, %c0_48], %54 {strides = array<i32>} : memref<8x128xf32, #tpu.memory_space<vmem>>, vector<8x128xf32>,
    return
  }
  func.func @transform_0(%arg0: i32) -> (i32, i32) {
    %c0_i32 = arith.constant 0 : i32
    %c0_i32_0 = arith.constant 0 : i32
    return %arg0, %c0_i32 : i32, i32
  }
  func.func @transform_1(%arg0: i32) -> (i32, i32) {
    %c0_i32 = arith.constant 0 : i32
    %c0_i32_0 = arith.constant 0 : i32
    %c0_i32_1 = arith.constant 0 : i32
    return %c0_i32, %c0_i32_0 : i32, i32
  }
  func.func @transform_2(%arg0: i32) -> (i32, i32) {
    %c0_i32 = arith.constant 0 : i32
    %c0_i32_0 = arith.constant 0 : i32
    %c0_i32_1 = arith.constant 0 : i32
    return %c0_i32, %c0_i32_0 : i32, i32
  }
  func.func @transform_3(%arg0: i32) -> (i32, i32) {
    %c0_i32 = arith.constant 0 : i32
    %c0_i32_0 = arith.constant 0 : i32
    %c0_i32_1 = arith.constant 0 : i32
    return %c0_i32, %c0_i32_0 : i32, i32
  }
  func.func @transform_4(%arg0: i32) -> (i32, i32) {
    %c0_i32 = arith.constant 0 : i32
    %c0_i32_0 = arith.constant 0 : i32
    %c0_i32_1 = arith.constant 0 : i32
    return %c0_i32, %c0_i32_0 : i32, i32
  }
  func.func @transform_5(%arg0: i32) -> (i32, i32) {
    %c0_i32 = arith.constant 0 : i32
    %c0_i32_0 = arith.constant 0 : i32
    %c0_i32_1 = arith.constant 0 : i32
    return %c0_i32, %c0_i32_0 : i32, i32
  }
  func.func @transform_6(%arg0: i32) -> (i32, i32) {
    %c0_i32 = arith.constant 0 : i32
    %c0_i32_0 = arith.constant 0 : i32
    %c0_i32_1 = arith.constant 0 : i32
    return %c0_i32, %c0_i32_0 : i32, i32
  }
  func.func @transform_7(%arg0: i32) -> (i32, i32) {
    %c0_i32 = arith.constant 0 : i32
    %c0_i32_0 = arith.constant 0 : i32
    %c0_i32_1 = arith.constant 0 : i32
    return %c0_i32, %c0_i32_0 : i32, i32
  }
  func.func @transform_8(%arg0: i32) -> (i32, i32) {
    %c0_i32 = arith.constant 0 : i32
    %c0_i32_0 = arith.constant 0 : i32
    %c0_i32_1 = arith.constant 0 : i32
    return %c0_i32, %c0_i32_0 : i32, i32
  }
  func.func @transform_9(%arg0: i32) -> (i32, i32) {
    %c0_i32 = arith.constant 0 : i32
    %c0_i32_0 = arith.constant 0 : i32
    %c0_i32_1 = arith.constant 0 : i32
    return %c0_i32, %c0_i32_0 : i32, i32
  }
  func.func @transform_10(%arg0: i32) -> (i32, i32) {
    %c0_i32 = arith.constant 0 : i32
    %c0_i32_0 = arith.constant 0 : i32
    %c0_i32_1 = arith.constant 0 : i32
    return %c0_i32, %c0_i32_0 : i32, i32
  }
  func.func @transform_11(%arg0: i32) -> (i32, i32) {
    %c0_i32 = arith.constant 0 : i32
    %c0_i32_0 = arith.constant 0 : i32
    %c0_i32_1 = arith.constant 0 : i32
    return %c0_i32, %c0_i32_0 : i32, i32
  }
  func.func @transform_12(%arg0: i32) -> (i32, i32) {
    %c0_i32 = arith.constant 0 : i32
    %c0_i32_0 = arith.constant 0 : i32
    %c0_i32_1 = arith.constant 0 : i32
    return %c0_i32, %c0_i32_0 : i32, i32
  }
  func.func @transform_13(%arg0: i32) -> (i32, i32) {
    %c0_i32 = arith.constant 0 : i32
    %c0_i32_0 = arith.constant 0 : i32
    %c0_i32_1 = arith.constant 0 : i32
    return %c0_i32, %c0_i32_0 : i32, i32
  }
  func.func @transform_14(%arg0: i32) -> (i32, i32) {
    %c0_i32 = arith.constant 0 : i32
    %c0_i32_0 = arith.constant 0 : i32
    %c0_i32_1 = arith.constant 0 : i32
    return %c0_i32, %c0_i32_0 : i32, i32
  }
  func.func @transform_15(%arg0: i32) -> (i32, i32) {
    %c0_i32 = arith.constant 0 : i32
    %c0_i32_0 = arith.constant 0 : i32
    %c0_i32_1 = arith.constant 0 : i32
    return %c0_i32, %c0_i32_0 : i32, i32
  }
  func.func @transform_16(%arg0: i32) -> (i32, i32) {
    %c0_i32 = arith.constant 0 : i32
    %c0_i32_0 = arith.constant 0 : i32
    %c0_i32_1 = arith.constant 0 : i32
    return %c0_i32, %c0_i32_0 : i32, i32
  }
  func.func @transform_17(%arg0: i32) -> (i32, i32) {
    %c0_i32 = arith.constant 0 : i32
    %c0_i32_0 = arith.constant 0 : i32
    return %arg0, %c0_i32 : i32, i32
  }
}

</mosaic_0001>

<bundles_post_ra>
// kernel: tpu_custom_call.1
= control target key start
LH: loop header
LB: loop body
LE: loop exit
PB: predicated region body
PF: predicated region fallthrough
CT: control target
= control target key end

     0   :  { %s2260_s0 = inlined_call_operand.vmem [shape: f32[16,16], index: 0, kind: input, shape index: {}]   ;;  %s2261_s1 = inlined_call_operand.hbm [shape: f32[16,32], index: 1, kind: input, shape index: {}]   ;;  %s2262_s2 = inlined_call_operand.hbm [shape: f32[1,32], index: 2, kind: input, shape index: {}]   ;;  %s2263_s3 = inlined_call_operand.vmem [shape: f32[32,32], index: 3, kind: input, shape index: {}]   ;;  %s2264_s4 = inlined_call_operand.hbm [shape: f32[1,32], index: 4, kind: input, shape index: {}]   ;;  %s2265_s5 = inlined_call_operand.vmem [shape: f32[32,16], index: 5, kind: input, shape index: {}]   ;;  %s2266_s6 = inlined_call_operand.hbm [shape: f32[1,16], index: 6, kind: input, shape index: {}]   ;;  %s2267_s7 = inlined_call_operand.vmem [shape: f32[16,8], index: 7, kind: input, shape index: {}]   ;;  %s2268_s8 = inlined_call_operand.hbm [shape: f32[1,8], index: 8, kind: input, shape index: {}]   ;;  %s2269_s9 = inlined_call_operand.vmem [shape: f32[8,16], index: 9, kind: input, shape index: {}]   ;;  %s2270_s10 = inlined_call_operand.vmem [shape: f32[1,16], index: 10, kind: input, shape index: {}]   ;;  %s2271_s11 = inlined_call_operand.vmem [shape: f32[16,32], index: 11, kind: input, shape index: {}]   ;;  %s2272_s12 = inlined_call_operand.vmem [shape: f32[1,32], index: 12, kind: input, shape index: {}]   ;;  %s2273_s13 = inlined_call_operand.vmem [shape: f32[32,32], index: 13, kind: input, shape index: {}]   ;;  %s2274_s14 = inlined_call_operand.vmem [shape: f32[1,32], index: 14, kind: input, shape index: {}]   ;;  %s2275_s15 = inlined_call_operand.vmem [shape: f32[32,16], index: 15, kind: input, shape index: {}]   ;;  %s2276_s16 = inlined_call_operand.vmem [shape: f32[1,16], index: 16, kind: input, shape index: {}]   ;;  %s2277_s17 = inlined_call_operand.hbm [shape: f32[16,128], index: 17, kind: output, shape index: {}]  }
   0x1   :  { %2288 = sst [smem:[#allocation22_spill]] %s2260_s0 }
   0x2   :  { %2289 = sst [smem:[#allocation23_spill]] %s2261_s1 }
   0x3   :  { %2290 = sst [smem:[#allocation24_spill]] %s2262_s2 }
   0x4   :  { %2291 = sst [smem:[#allocation25_spill]] %s2266_s6 }
   0x5   :  { %2292 = sst [smem:[#allocation26_spill]] %s2277_s17 }
   0x6   :  { %22 = vsyncpa [#allocation3], 0 }
   0x7   :  { %23 = vsyncpa [#allocation6], 0 }
   0x8   :  { %24 = vsyncpa [#allocation9], 0 }
   0x9   :  { %25 = vsyncpa [#allocation4], 0 }
   0xa   :  { %27 = vsyncpa [#allocation4 + $0x1], 0  ;;  %s1970_s24 = smov 0   ;;  %s1972_s25 = smov 0  }
   0xb   :  { %s1974_s26 = smov 0   ;;  %s1976_s27 = smov 0  }
   0xc LB: > { %2293 = sst [smem:[#allocation16_spill]] %s1852_s24  ;;  %s1991_s28 = sadd.s32 4294967295, %s1864_s27   ;;  %s1864_s27 = sphi %s1976_s27, %s2321_s27   ;;  %s1860_s26 = sphi %s1974_s26, %s2323_s26   ;;  %s1856_s25 = sphi %s1972_s25, %s2325_s25   ;;  %s1852_s24 = sphi %s1970_s24, %s2324_s24  }
   0xd   : > { %2294 = sst [smem:[#allocation17_spill]] %s1860_s26  ;;  %s1427_s29 = sadd.s32 4294967294, %s1864_s27  }
   0xe   : > { %2295 = sst [smem:[#allocation18_spill]] %s1864_s27  ;;  %s1995_s0 = sadd.s32 1, %s1864_s27  }
   0xf   : > { %2296 = sst [smem:[#allocation19_spill]] %s1995_s0  ;;  %s402_s30 = sadd.s32 1, %s1860_s26 }
  0x10   : > { %s399_s18 = ssub.s32 %s1864_s27, %s1995_s0  ;;  %p412_p0 = scmp.ne.s32.totalorder %s1860_s26, %s1856_s25 }
  0x11   : > { %p400_p1 = scmp.eq.s32.totalorder %s399_s18, 0  ;;  %p413_p2 = scmp.eq.s32.totalorder %s1991_s28, 1 }
  0x12   : > { %p418_p3 = scmp.ne.s32.totalorder %s1856_s25, %s1852_s24  ;;  %p419_p4 = scmp.eq.s32.totalorder %s1427_s29, 1 }
  0x13   : > { %s2006_s19 = scalar_select %p400_p1, %s1860_s26, %s402_s30  }
  0x14   : > { %p2008_p5 = por %p413_p2, %p412_p0  ;;  %p2012_p6 = por %p419_p4, %p418_p3 }
  0x15   : > { %2297 = sst [smem:[#allocation20_spill]] %s2006_s19  ;;  %p1428_p7 = scmp.ge.s32.totalorder %s1864_s27, 1 }
  0x16   : > { %s2298_s1 = scalar_select %p2008_p5, 1, 0 }
  0x17   : > { %s2299_s20 = scalar_select %p2012_p6, 1, 0 }
  0x18   : > { %p426_p8 = scmp.lt.s32.totalorder %s1864_s27, 3  ;;  %p2283_p9 = scmp.eq.s32.totalorder %s1991_s28, 0 }
  0x19   : > { %2300 = sst [smem:[#allocation21_spill]] %s2299_s20  ;;  %s1866_s22 = smov [#allocation5]  }
  0x1a   : > { %p2019_p10 = pnand %p1428_p7, %p426_p8  ;;  %s452_s23 = sshll.u32 %s1866_s22, 4  ;;  %s453_s23 = int_to_ptr.vmem [resolvable:$true] %s452_s23 }
  0x1b   : > { %s1867_s29 = smov [#allocation8]   ;;  %s1868_s19 = smov [#allocation2]  }
  0x1c   : > { %s2301_s21 = scalar_select %p2019_p10, 1, 0 }
  0x1d   : > { %p1586_p11 = pneg %p2019_p10  ;;  %s480_s30 = sshll.u32 %s1867_s29, 4  ;;  %s481_s30 = int_to_ptr.vmem [resolvable:$true] %s480_s30 }
  0x1e   : > { %s438_s26 = sshll.u32 %s1868_s19, 4  ;;  %s1673_s22 = scalar_lea.vmem %s453_s23, 16  ;;  %s2031_s26 = int_to_ptr.vmem [resolvable:$true] %s438_s26 }
  0x1f   : > { %p2027_p12 = pnand %p2283_p9, %p1586_p11  ;;  %p1674_p0 = scmp.ne.s32.totalorder %s453_s23, %s1673_s22 }
  0x20   : > { %s1680_s29 = scalar_lea.vmem %s453_s23, 32  ;;  %p1681_p3 = scmp.lt.s32.totalorder %s453_s23, %s453_s23 }
  0x21   : > { %p2035_p13 = pneg %p2027_p12  ;;  %p1682_p4 = scmp.lt.s32.totalorder %s1680_s29, %s1673_s22 }
  0x23   : > { %p1676_p1 = pnand %p1674_p0, %p2035_p13  ;;  %p1683_p7 = por %p1682_p4, %p1681_p3 }
  0x25   : > { %p1677_p2 = pneg %p1676_p1 }
  0x27   : > { %p1684_p8 = pnand %p1683_p7, %p1677_p2 }
  0x29   : > { %1687 = shalt.err (!%p1684_p8)
}
  0x2a   : > { %s2304_s2 = sld [smem:[#allocation24_spill]]  ;;  %s1699_s24 = scalar_lea.vmem %s481_s30, 16 }
  0x2b   : > { %p1700_p11 = scmp.ne.s32.totalorder %s481_s30, %s1699_s24  ;;  %s1706_s27 = scalar_lea.vmem %s481_s30, 32 }
  0x2c   : > { %p1707_p0 = scmp.lt.s32.totalorder %s481_s30, %s481_s30  ;;  %p1708_p1 = scmp.lt.s32.totalorder %s1706_s27, %s1699_s24 }
  0x2d   : > { %p1702_p9 = pnand %p1700_p11, %p2035_p13 }
  0x2e   : > { %p1709_p5 = por %p1708_p1, %p1707_p0 }
  0x2f   : > { %p1703_p6 = pneg %p1702_p9 }
  0x30   : > { %1592 = dma.hbm_to_vmem [thread:$0]  (!%p2027_p12), %s2304_s2, 16, %s453_s23, [#allocation6]  }
  0x31   : > { %p1710_p10 = pnand %p1709_p5, %p1703_p6 }
  0x33   : > { %1713 = shalt.err (!%p1710_p10)
}
  0x34   : > { %s2305_s6 = sld [smem:[#allocation25_spill]]  ;;  %s1725_s20 = scalar_lea.vmem %s2031_s26, 256 }
  0x35   : > { %p1726_p2 = scmp.ne.s32.totalorder %s2031_s26, %s1725_s20  ;;  %p1733_p4 = scmp.lt.s32.totalorder %s2031_s26, %s2031_s26 }
  0x36   : > { %p1734_p7 = scmp.lt.s32.totalorder %s1725_s20, %s1725_s20 }
  0x37   : > { %p1728_p9 = pnand %p1726_p2, %p2035_p13 }
  0x38   : > { %p1735_p5 = por %p1734_p7, %p1733_p4 }
  0x39   : > { %p1729_p3 = pneg %p1728_p9 }
  0x3a   : > { %1598 = dma.hbm_to_vmem [thread:$0]  (!%p2027_p12), %s2305_s6, 16, %s481_s30, [#allocation9]  }
  0x3b   : > { %p1736_p6 = pnand %p1735_p5, %p1729_p3 }
  0x3d   : > { %1739 = shalt.err (!%p1736_p6)
}
  0x3e   : > { %s1869_s24 = smov 128   ;;  %s1870_s27 = smov 8  }
  0x3f   : > { %s2306_s30 = sld [smem:[#allocation23_spill]]  ;;  %s1871_s22 = smov [#allocation7]  }
  0x40   : > { %s466_s29 = sshll.u32 %s1871_s22, 4  ;;  %s1872_s2 = smov [#allocation10]   ;;  %s467_s29 = int_to_ptr.vmem [resolvable:$true] %s466_s29 }
  0x41   : > { %s494_s6 = sshll.u32 %s1872_s2, 4  ;;  %s1751_s17 = scalar_lea.vmem %s467_s29, 16  ;;  %s495_s6 = int_to_ptr.vmem [resolvable:$true] %s494_s6 }
  0x42   : > { %p1752_p10 = scmp.ne.s32.totalorder %s467_s29, %s1751_s17  ;;  %s1758_s20 = scalar_lea.vmem %s467_s29, 32 }
  0x43   : > { %p1759_p0 = scmp.lt.s32.totalorder %s467_s29, %s467_s29  ;;  %p1760_p1 = scmp.lt.s32.totalorder %s1758_s20, %s1751_s17 }
  0x44   : > { %p1754_p8 = pnand %p1752_p10, %p2035_p13 }
  0x45   : > { %1589 = dma.hbm_to_vmem [thread:$0]  (!%p2027_p12), %s2306_s30, 256, %s2031_s26, [#allocation3], %s1869_s24, %s1869_s24, %s1870_s27  }
  0x46   : > { %p1755_p11 = pneg %p1754_p8  ;;  %p1761_p2 = por %p1760_p1, %p1759_p0 }
  0x48   : > { %p1762_p9 = pnand %p1761_p2, %p1755_p11 }
  0x4a   : > { %1765 = shalt.err (!%p1762_p9)
}
  0x4b   : > { %1595 = dma.hbm_to_vmem [thread:$0]  (!%p2027_p12), %s2264_s4, 16, %s467_s29, [#allocation6]  }
  0x4c   : > { %s1777_s2 = scalar_lea.vmem %s495_s6, 16  ;;  %s1784_s24 = scalar_lea.vmem %s495_s6, 32 }
  0x4d   : > { %p1778_p3 = scmp.ne.s32.totalorder %s495_s6, %s1777_s2  ;;  %p1785_p5 = scmp.lt.s32.totalorder %s495_s6, %s495_s6 }
  0x4e   : > { %p1786_p6 = scmp.lt.s32.totalorder %s1784_s24, %s1777_s2 }
  0x4f   : > { %p1780_p4 = pnand %p1778_p3, %p2035_p13 }
  0x50   : > { %p1787_p10 = por %p1786_p6, %p1785_p5 }
  0x51   : > { %p1781_p7 = pneg %p1780_p4 }
  0x53   : > { %p1788_p8 = pnand %p1787_p10, %p1781_p7 }
  0x55   : > { %1791 = shalt.err (!%p1788_p8)
}
  0x56   : > { %1601 = dma.hbm_to_vmem [thread:$0]  (!%p2027_p12), %s2268_s8, 16, %s495_s6, [#allocation9]  }
  0x57   : > { %p2307_p11 = scmp.ne.s32.totalorder %s2301_s21, 0 }
  0x58   : > { %p2308_p0 = scmp.eq.s32.totalorder (!%p2307_p11), %s1991_s28, 0 }
  0x59   : > { %538 = sbr.rel (%p2307_p11) target bundleno = 1699 (0x6a3), region = 88 }
  0x5e   : > { %1835 = dma.done.wait (%p2308_p0), [#allocation3], 256   ;;  %p2309_p13 = pmov %p2308_p0 }
  0x5f   : > { %p2310_p1 = pmov %p2308_p0 }
  0x60   : > { %1837 = vsyncadd (%p2309_p13), [#allocation3], 4294967040 }
  0x61   : > { %1839 = dma.done.wait (%p2310_p1), [#allocation6], 32   ;;  %p2311_p2 = pmov %p2308_p0 }
  0x62   : > { %p2312_p9 = pmov %p2308_p0 }
  0x63   : > { %1841 = vsyncadd (%p2311_p2), [#allocation6], 4294967264 }
  0x64   : > { %1843 = dma.done.wait (%p2312_p9), [#allocation9], 32   ;;  %p2313_p12 = pmov %p2308_p0 }
  0x65   : > { %p605_p3 = scmp.lt.s32.totalorder %s1991_s28, 1  ;;  %v1873_v0 = vmov 0.0   ;;  %vm1874_vm0 = vmmov 0   ;;  %s2314_s19 = sld [smem:[#allocation22_spill]]  ;;  %v611_v1 = vld [vmem:[#allocation2 + $0x8] sm:$0xff]  ;;  %v610_v2 = vld [vmem:[#allocation2] sm:$0xff] }
  0x66   : > { %1845 = vsyncadd (%p2313_p12), [#allocation9], 4294967264  ;;  %1494 = vmatprep.subr.mxu0 %v1873_v0  ;;  %1498 = vmatprep.mubr.msk.f32.mxu0 %vm1874_vm0, %v1873_v0  ;;  %vm619_vm1 = vcmask 130048   ;;  %v697_v4 = vld [vmem:[%s2263_s3 + $0x18] sm:$0xff]  ;;  %v696_v5 = vld [vmem:[%s2263_s3 + $0x10] sm:$0xff]  ;;  %vm705_vm2 = vcmask 261120  }
  0x67   : > { %s606_s6 = scalar_select %p605_p3, %s1991_s28, 1  ;;  %1501 = vmatprep.subr.mxu1 %v1873_v0  ;;  %1509 = vmatprep.mubr.msk.f32.mxu1 %vm1874_vm0, %v1873_v0  ;;  %v695_v6 = vld [vmem:[%s2263_s3 + $0x8] sm:$0xff]  ;;  %v694_v7 = vld [vmem:[%s2263_s3] sm:$0xff]  ;;  %v783_v8 = vld [vmem:[%s2265_s5 + $0x18] sm:$0xff]  ;;  %vm955_vm3 = vcmask 64512   ;;  %vm1295_vm4 = vcmask 392192  }
  0x68   : > { %1495 = vmatpush3.msra.mxu0 %v611_v1  ;;  %1502 = vmatpush3.msra.mxu1 %v697_v4  ;;  %v1443_v9 = vld [vmem:[#allocation5] ss:$0 sm:$0xff]  ;;  %v781_v15 = vld [vmem:[%s2265_s5 + $0x8] sm:$0xff]  ;;  %v780_v16 = vld [vmem:[%s2265_s5] sm:$0xff]  ;;  %s1876_s20 = smov 48   ;;  %s602_s17 = sand.u32 1, %s1856_s25  }
  0x69   : > { %s1442_s0 = sshll.u32 %s606_s6, 3  ;;  %1496 = vmatprep.subr.mxu0 %v1873_v0  ;;  %1503 = vmatprep.subr.mxu1 %v1873_v0  ;;  %v782_v14 = vld [vmem:[%s2265_s5 + $0x10] sm:$0xff]  ;;  %v866_v22 = vld [vmem:[%s2267_s7 + $0x8] sm:$0xff]  ;;  %v865_v23 = vld [vmem:[%s2267_s7] sm:$0xff]  ;;  %s1877_s6 = smov 80   ;;  %vm1297_vm5 = vcmask 654336  }
  0x6a   : > { %1497 = vmatpush3.msra.mxu0 %v610_v2  ;;  %1504 = vmatpush3.msra.mxu1 %v696_v5  ;;  %v1445_v17 = vld [vmem:[#allocation7] ss:$0 sm:$0xff]  ;;  %v947_v24 = vld [vmem:[%s2269_s9] sm:$0xff]  ;;  %v1447_v25 = vld [vmem:[#allocation8] ss:$0 sm:$0xff]  ;;  %s1441_s27 = sshll.u32 %s602_s17, 3 }
  0x6b   : > { %s608_s30 = scalar_lea.vmem %s2314_s19, %s1442_s0  ;;  %1512 = vmatprep.subr.mxu0 %v1873_v0  ;;  %1505 = vmatprep.subr.mxu1 %v1873_v0  ;;  %s1875_s0 = smov 16   ;;  %v1449_v30 = vld [vmem:[#allocation10] ss:$0 sm:$0xff]  ;;  %v1031_v34 = vld [vmem:[%s2271_s11 + $0x8] sm:$0xff]  ;;  %v1030_v35 = vld [vmem:[%s2271_s11] sm:$0xff]  ;;  %vm1299_vm6 = vcmask 785408  }
  0x6c   : > { %v609_v3 = vld [vmem:[%s608_s30] sm:$0xff]  ;;  %1506 = vmatpush3.msra.mxu1 %v695_v6  ;;  %v1116_v36 = vld [vmem:[%s2273_s13 + $0x18] sm:$0xff]  ;;  %v1115_v42 = vld [vmem:[%s2273_s13 + $0x10] sm:$0xff]  ;;  %s1460_s21 = sshll.u32 %s1991_s28, 7  ;;  %s604_s18 = scalar_lea.vmem [#allocation11], %s1441_s27  ;;  %vm1301_vm7 = vcmask 850944  }
  0x6d   : > { %1499 = vmatmul.mubr.msk.f32.vlgmr.msra.gmra.mxu0 %vm619_vm1, %v609_v3  ;;  %1507 = vmatprep.subr.mxu1 %v1873_v0  ;;  %v1451_v37 = vld [vmem:[%s2270_s10] ss:$0 sm:$0xff]  ;;  %v1114_v43 = vld [vmem:[%s2273_s13 + $0x8] sm:$0xff]  ;;  %v1201_v45 = vld [vmem:[%s2275_s15 + $0x18] sm:$0xff]  ;;  %s1318_s19 = sshll.u32 %s604_s18, 4  ;;  %s2315_s29 = sld [smem:[#allocation26_spill]]  ;;  %s1319_s19 = int_to_ptr.vmem [resolvable:$true] %s1318_s19 }
  0x6e   : > { %1520 = vmatprep.mubr.msk.f32.mxu0 %vm1874_vm0, %v1873_v0  ;;  %1508 = vmatpush3.msra.mxu1 %v694_v7  ;;  %v1113_v44 = vld [vmem:[%s2273_s13] sm:$0xff]  ;;  %v1200_v51 = vld [vmem:[%s2275_s15 + $0x10] sm:$0xff]  ;;  %v1199_v52 = vld [vmem:[%s2275_s15 + $0x8] sm:$0xff]  ;;  %s1305_s23 = scalar_lea.sflag [#allocation4], %s602_s17  ;;  %s1792_s26 = scalar_lea.vmem %s1319_s19, 128 }
  0x6f   : > { %1523 = vmatprep.subr.mxu1 %v1873_v0  ;;  %1513 = vmatpush3.msra.mxu0 %v783_v8  ;;  %v1453_v46 = vld [vmem:[%s2272_s12] ss:$0 sm:$0xff]  ;;  %p1793_p4 = scmp.ne.s32.totalorder %s1319_s19, %s1792_s26  ;;  %p2316_p7 = scmp.ne.s32.totalorder %s2298_s1, 0 }
  0x70   : > { %1514 = vmatprep.subr.mxu0 %v1873_v0  ;;  %v1198_v53 = vld [vmem:[%s2275_s15] sm:$0xff]  ;;  %s1879_s28 = smov [#allocation11]  }
  0x71   : > { %1515 = vmatpush3.msra.mxu0 %v782_v14  ;;  %v1455_v54 = vld [vmem:[%s2274_s14] ss:$0 sm:$0xff]  ;;  %p1794_p5 = pnand %p1793_p4, %p2316_p7  ;;  %s1796_s2 = sshll.u32 %s1879_s28, 4  ;;  %s1797_s2 = int_to_ptr.vmem [resolvable:$false] %s1796_s2 }
  0x72   : > { %1516 = vmatprep.subr.mxu0 %v1873_v0  ;;  %v1457_v59 = vld [vmem:[%s2276_s16] ss:$0 sm:$0xff]  ;;  %s1798_s24 = scalar_lea.vmem %s1797_s2, 256  ;;  %p1799_p10 = scmp.lt.s32.totalorder %s1319_s19, %s1797_s2 }
  0x73   : > { %1517 = vmatpush3.msra.mxu0 %v781_v15  ;;  %p1795_p6 = pneg %p1794_p5  ;;  %p1800_p8 = scmp.lt.s32.totalorder %s1798_s24, %s1792_s26 }
  0x74   : > { %1518 = vmatprep.subr.mxu0 %v1873_v0 }
  0x75   : > { %1519 = vmatpush3.msra.mxu0 %v780_v16  ;;  %p1801_p11 = por %p1800_p8, %p1799_p10 }
  0x76   : > { %1530 = vmatprep.subr.mxu0 %v1873_v0 }
  0x77   : > { %p1802_p0 = pnand %p1801_p11, %p1795_p6 }
 0x12d   : > { %v689_v10 = vpop.f32.mrf.mxu0 }
 0x12e   : > { %v690_v11 = vadd.f32 %v1443_v9, %v689_v10 }
 0x12f   : > { %v1500_v12 = vpop.f32.mrf.mxu0 }
 0x130   : > { %v693_v13 = vmax.f32 %v690_v11, 0.0 }
 0x132   : > { %1282 = vrot.lane.b32.xlu0 %v693_v13, %s1875_s0  ;;  %1510 = vmatmul.mubr.msk.f32.vlgmr.msra.gmra.mxu1 %vm705_vm2, %v693_v13  ;;  %s1878_s0 = smov 96  }
 0x133   : > { %1527 = vmatprep.mubr.msk.f32.mxu1 %vm1874_vm0, %v1873_v0  ;;  %1524 = vmatpush3.msra.mxu1 %v866_v22 }
 0x134   : > { %1525 = vmatprep.subr.mxu1 %v1873_v0 }
 0x135   : > { %1526 = vmatpush3.msra.mxu1 %v865_v23 }
 0x136   : > { %1535 = vmatprep.subr.mxu1 %v1873_v0 }
 0x1a4   : > { %v1283_v60 = vpop.permute.xlu0 %1282 }
 0x1f2   : > { %v775_v18 = vpop.f32.mrf.mxu1 }
 0x1f3   : > { %v776_v19 = vadd.f32 %v1445_v17, %v775_v18 }
 0x1f4   : > { %v1511_v20 = vpop.f32.mrf.mxu1 }
 0x1f5   : > { %v779_v21 = vmax.f32 %v776_v19, 0.0 }
 0x1f7   : > { %1285 = vrot.lane.b32.xlu0 %v779_v21, %s1876_s20  ;;  %1521 = vmatmul.mubr.msk.f32.vlgmr.msra.gmra.mxu0 %vm705_vm2, %v779_v21  ;;  %s2225_s20 = scalar_lea.hbm %s2315_s29, %s1460_s21 }
 0x1f8   : > { %1532 = vmatprep.mubr.msk.f32.mxu0 %vm1874_vm0, %v1873_v0  ;;  %1531 = vmatpush3.msra.mxu0 %v947_v24 }
 0x1f9   : > { %1542 = vmatprep.subr.mxu0 %v1873_v0 }
 0x269   : > { %v1286_v1 = vpop.permute.xlu0 %1285 }
 0x2b7   : > { %v860_v26 = vpop.f32.mrf.mxu0 }
 0x2b8   : > { %v861_v27 = vadd.f32 %v1447_v25, %v860_v26 }
 0x2b9   : > { %v1522_v28 = vpop.f32.mrf.mxu0 }
 0x2ba   : > { %v864_v29 = vmax.f32 %v861_v27, 0.0 }
 0x2bc   : > { %1288 = vrot.lane.b32.xlu1 %v864_v29, %s1877_s6  ;;  %1528 = vmatmul.mubr.msk.f32.vlgmr.msra.gmra.mxu1 %vm619_vm1, %v864_v29 }
 0x2bd   : > { %1539 = vmatprep.mubr.msk.f32.mxu1 %vm1874_vm0, %v1873_v0  ;;  %1536 = vmatpush3.msra.mxu1 %v1031_v34 }
 0x2be   : > { %1537 = vmatprep.subr.mxu1 %v1873_v0 }
 0x2bf   : > { %1538 = vmatpush3.msra.mxu1 %v1030_v35 }
 0x2c0   : > { %1553 = vmatprep.subr.mxu1 %v1873_v0 }
 0x32e   : > { %v1289_v62 = vpop.permute.xlu1 %1288 }
 0x37c   : > { %v943_v31 = vpop.f32.mrf.mxu1 }
 0x37d   : > { %v944_v32 = vadd.f32 %v1449_v30, %v943_v31 }
 0x37e   : > { %v1529_v33 = vpop.f32.mrf.mxu1 }
 0x37f   : > { %1291 = vrot.lane.b32.xlu1 %v944_v32, %s1878_s0  ;;  %1533 = vmatmul.mubr.msk.f32.vlgmr.msra.gmra.mxu0 %vm955_vm3, %v944_v32 }
 0x380   : > { %1550 = vmatprep.mubr.msk.f32.mxu0 %vm1874_vm0, %v1873_v0  ;;  %1543 = vmatpush3.msra.mxu0 %v1116_v36 }
 0x381   : > { %1544 = vmatprep.subr.mxu0 %v1873_v0 }
 0x382   : > { %1545 = vmatpush3.msra.mxu0 %v1115_v42 }
 0x383   : > { %1546 = vmatprep.subr.mxu0 %v1873_v0 }
 0x384   : > { %1547 = vmatpush3.msra.mxu0 %v1114_v43 }
 0x385   : > { %1548 = vmatprep.subr.mxu0 %v1873_v0 }
 0x386   : > { %1549 = vmatpush3.msra.mxu0 %v1113_v44 }
 0x3f1   : > { %v1292_v4 = vpop.permute.xlu1 %1291 }
 0x43f   : > { %v1025_v38 = vpop.f32.mrf.mxu0 }
 0x440   : > { %v1026_v39 = vadd.f32 %v1451_v37, %v1025_v38 }
 0x441   : > { %v1534_v40 = vpop.f32.mrf.mxu0 }
 0x442   : > { %v1029_v41 = vmax.f32 %v1026_v39, 0.0 }
 0x444   : > { %1540 = vmatmul.mubr.msk.f32.vlgmr.msra.gmra.mxu1 %vm619_vm1, %v1029_v41 }
 0x445   : > { %1561 = vmatprep.mubr.msk.f32.mxu1 %vm1874_vm0, %v1873_v0  ;;  %1554 = vmatpush3.msra.mxu1 %v1201_v45 }
 0x446   : > { %1555 = vmatprep.subr.mxu1 %v1873_v0 }
 0x447   : > { %1556 = vmatpush3.msra.mxu1 %v1200_v51 }
 0x448   : > { %1557 = vmatprep.subr.mxu1 %v1873_v0 }
 0x449   : > { %1558 = vmatpush3.msra.mxu1 %v1199_v52 }
 0x44a   : > { %1559 = vmatprep.subr.mxu1 %v1873_v0 }
 0x44b   : > { %1560 = vmatpush3.msra.mxu1 %v1198_v53 }
 0x504   : > { %v1108_v47 = vpop.f32.mrf.mxu1 }
 0x505   : > { %v1109_v48 = vadd.f32 %v1453_v46, %v1108_v47 }
 0x506   : > { %v1541_v49 = vpop.f32.mrf.mxu1 }
 0x507   : > { %v1112_v50 = vmax.f32 %v1109_v48, 0.0 }
 0x509   : > { %1551 = vmatmul.mubr.msk.f32.vlgmr.msra.gmra.mxu0 %vm705_vm2, %v1112_v50 }
 0x5c9   : > { %v1193_v55 = vpop.f32.mrf.mxu0 }
 0x5ca   : > { %v1194_v56 = vadd.f32 %v1455_v54, %v1193_v55 }
 0x5cb   : > { %v1552_v57 = vpop.f32.mrf.mxu0 }
 0x5cc   : > { %v1197_v58 = vmax.f32 %v1194_v56, 0.0 }
 0x5ce   : > { %1562 = vmatmul.mubr.msk.f32.vlgmr.msra.gmra.mxu1 %vm705_vm2, %v1197_v58 }
 0x68e   : > { %v1278_v61 = vpop.f32.mrf.mxu1 }
 0x68f   : > { %v1279_v63 = vadd.f32 %v1457_v59, %v1278_v61 }
 0x690   : > { %v1563_v0 = vpop.f32.mrf.mxu1 }
 0x691   : > { %v1294_v2 = vsel %vm619_vm1, %v1279_v63, %v1283_v60 }
 0x692   : > { %v1296_v3 = vsel %vm1295_vm4, %v1294_v2, %v1286_v1 }
 0x693   : > { %v1298_v5 = vsel %vm1297_vm5, %v1296_v3, %v1289_v62 }
 0x694   : > { %v1300_v6 = vsel %vm1299_vm6, %v1298_v5, %v1292_v4 }
 0x695   : > { %v1302_v7 = vsel %vm1301_vm7, %v1300_v6, 0.0 }
 0x696   : > { %1303 = vst [vmem:[%s604_s18] sm:$0xff] %v1302_v7 }
 0x697   : > { %1805 = shalt.err (!%p1802_p0)
}
 0x698   : > { %s1806_s27 = scalar_lea.hbm %s2225_s20, 128  ;;  %s1810_s0 = scalar_lea.hbm %s2315_s29, 256 }
 0x699   : > { %p1807_p13 = scmp.ne.s32.totalorder %s2225_s20, %s1806_s27  ;;  %p1811_p9 = scmp.lt.s32.totalorder %s2225_s20, %s2315_s29 }
 0x69a   : > { %p1812_p12 = scmp.lt.s32.totalorder %s1810_s0, %s1806_s27 }
 0x69b   : > { %p1808_p1 = pnand %p1807_p13, %p2316_p7 }
 0x69c   : > { %p1813_p3 = por %p1812_p12, %p1811_p9 }
 0x69d   : > { %p1809_p2 = pneg %p1808_p1 }
 0x69f   : > { %p1814_p4 = pnand %p1813_p3, %p1809_p2 }
 0x6a1   : > { %1817 = shalt.err (!%p1814_p4)
}
 0x6a2   : > { %1584 = dma.vmem_to_hbm [thread:$0]  (%p2316_p7), %s1319_s19, 128, %s2225_s20, %s1305_s23  }
 0x6a3 PF: > { %s2317_s30 = sld [smem:[#allocation18_spill]] }
 0x6a4   : > { %s2318_s22 = sld [smem:[#allocation16_spill]] }
 0x6a5   : > { %s2319_s26 = sld [smem:[#allocation21_spill]] }
 0x6a9   : > { %p1616_p5 = scmp.ge.s32.totalorder %s2317_s30, 2 }
 0x6aa   : > { %s1330_s28 = sand.u32 1, %s2318_s22  }
 0x6ab   : > { %p2320_p6 = scmp.ne.s32.totalorder %s2319_s26, 0  ;;  %s1331_s2 = scalar_lea.sflag [#allocation4], %s1330_s28 }
 0x6ad   : > { %p1603_p10 = pnand %p1616_p5, %p2320_p6 }
 0x6af   : > { %p1604_p8 = pneg %p1603_p10 }
 0x6b1   : > { %1847 = dma.done.wait (%p1604_p8), %s1331_s2, 128  }
 0x6b2   : > { %1849 = vsyncadd (%p1604_p8), %s1331_s2, 4294967168  ;;  %s2321_s27 = sld [smem:[#allocation19_spill]]  ;;  %s2324_s24 = smov %s1856_s25 }
 0x6b3   : > { %s2322_s17 = sld [smem:[#allocation17_spill]] }
 0x6b4   : > { %s2323_s26 = sld [smem:[#allocation20_spill]] }
 0x6b8   : > { %p30_p11 = scmp.ge.s32.totalorder %s2321_s27, 4  }
 0x6b9   : > { %s2325_s25 = smov %s2322_s17 }
 0x6ba   :  { %32 = sbr.rel (!%p30_p11) target bundleno = 12 (0xc), region = 144 }
 0x6bf   :  { %1336 = vsyncpa [#allocation3], 1 }
 0x6c0   :  { %1338 = vsyncpa [#allocation3 + $0x1], 1 }
 0x6c1   :  { %1339 = vsyncpa [#allocation6], 1 }
 0x6c2   :  { %1340 = vsyncpa [#allocation9], 1 }
 0x6c3   :  { %1341 = vsyncpa [#allocation4], 1 }
 0x6c4   :  { %1343 = vsyncpa [#allocation4 + $0x1], 1 }

// kernel: tpu_custom_call.1
= control target key start
LH: loop header
LB: loop body
LE: loop exit
PB: predicated region body
PF: predicated region fallthrough
CT: control target
= control target key end

     0   :  { %s2260_s0 = inlined_call_operand.vmem [shape: f32[16,16], index: 0, kind: input, shape index: {}]   ;;  %s2261_s1 = inlined_call_operand.hbm [shape: f32[16,32], index: 1, kind: input, shape index: {}]   ;;  %s2262_s2 = inlined_call_operand.hbm [shape: f32[1,32], index: 2, kind: input, shape index: {}]   ;;  %s2263_s3 = inlined_call_operand.vmem [shape: f32[32,32], index: 3, kind: input, shape index: {}]   ;;  %s2264_s4 = inlined_call_operand.hbm [shape: f32[1,32], index: 4, kind: input, shape index: {}]   ;;  %s2265_s5 = inlined_call_operand.vmem [shape: f32[32,16], index: 5, kind: input, shape index: {}]   ;;  %s2266_s6 = inlined_call_operand.hbm [shape: f32[1,16], index: 6, kind: input, shape index: {}]   ;;  %s2267_s7 = inlined_call_operand.vmem [shape: f32[16,8], index: 7, kind: input, shape index: {}]   ;;  %s2268_s8 = inlined_call_operand.hbm [shape: f32[1,8], index: 8, kind: input, shape index: {}]   ;;  %s2269_s9 = inlined_call_operand.vmem [shape: f32[8,16], index: 9, kind: input, shape index: {}]   ;;  %s2270_s10 = inlined_call_operand.vmem [shape: f32[1,16], index: 10, kind: input, shape index: {}]   ;;  %s2271_s11 = inlined_call_operand.vmem [shape: f32[16,32], index: 11, kind: input, shape index: {}]   ;;  %s2272_s12 = inlined_call_operand.vmem [shape: f32[1,32], index: 12, kind: input, shape index: {}]   ;;  %s2273_s13 = inlined_call_operand.vmem [shape: f32[32,32], index: 13, kind: input, shape index: {}]   ;;  %s2274_s14 = inlined_call_operand.vmem [shape: f32[1,32], index: 14, kind: input, shape index: {}]   ;;  %s2275_s15 = inlined_call_operand.vmem [shape: f32[32,16], index: 15, kind: input, shape index: {}]   ;;  %s2276_s16 = inlined_call_operand.vmem [shape: f32[1,16], index: 16, kind: input, shape index: {}]   ;;  %s2277_s17 = inlined_call_operand.hbm [shape: f32[16,128], index: 17, kind: output, shape index: {}]  }
   0x1   :  { %2288 = sst [smem:[#allocation22_spill]] %s2260_s0 }
   0x2   :  { %2289 = sst [smem:[#allocation23_spill]] %s2261_s1 }
   0x3   :  { %2290 = sst [smem:[#allocation24_spill]] %s2262_s2 }
   0x4   :  { %2291 = sst [smem:[#allocation25_spill]] %s2266_s6 }
   0x5   :  { %2292 = sst [smem:[#allocation26_spill]] %s2277_s17 }
   0x6   :  { %22 = vsyncpa [#allocation3], 0 }
   0x7   :  { %23 = vsyncpa [#allocation6], 0 }
   0x8   :  { %24 = vsyncpa [#allocation9], 0 }
   0x9   :  { %25 = vsyncpa [#allocation4], 0 }
   0xa   :  { %27 = vsyncpa [#allocation4 + $0x1], 0  ;;  %s1970_s24 = smov 0   ;;  %s1972_s25 = smov 0  }
   0xb   :  { %s1974_s26 = smov 0   ;;  %s1976_s27 = smov 0  }
   0xc LB: > { %2293 = sst [smem:[#allocation16_spill]] %s1852_s24  ;;  %s1991_s28 = sadd.s32 4294967295, %s1864_s27   ;;  %s1864_s27 = sphi %s1976_s27, %s2321_s27   ;;  %s1860_s26 = sphi %s1974_s26, %s2323_s26   ;;  %s1856_s25 = sphi %s1972_s25, %s2325_s25   ;;  %s1852_s24 = sphi %s1970_s24, %s2324_s24  }
   0xd   : > { %2294 = sst [smem:[#allocation17_spill]] %s1860_s26  ;;  %s1427_s29 = sadd.s32 4294967294, %s1864_s27  }
   0xe   : > { %2295 = sst [smem:[#allocation18_spill]] %s1864_s27  ;;  %s1995_s0 = sadd.s32 1, %s1864_s27  }
   0xf   : > { %2296 = sst [smem:[#allocation19_spill]] %s1995_s0  ;;  %s402_s30 = sadd.s32 1, %s1860_s26 }
  0x10   : > { %s399_s18 = ssub.s32 %s1864_s27, %s1995_s0  ;;  %p412_p0 = scmp.ne.s32.totalorder %s1860_s26, %s1856_s25 }
  0x11   : > { %p400_p1 = scmp.eq.s32.totalorder %s399_s18, 0  ;;  %p413_p2 = scmp.eq.s32.totalorder %s1991_s28, 1 }
  0x12   : > { %p418_p3 = scmp.ne.s32.totalorder %s1856_s25, %s1852_s24  ;;  %p419_p4 = scmp.eq.s32.totalorder %s1427_s29, 1 }
  0x13   : > { %s2006_s19 = scalar_select %p400_p1, %s1860_s26, %s402_s30  }
  0x14   : > { %p2008_p5 = por %p413_p2, %p412_p0  ;;  %p2012_p6 = por %p419_p4, %p418_p3 }
  0x15   : > { %2297 = sst [smem:[#allocation20_spill]] %s2006_s19  ;;  %p1428_p7 = scmp.ge.s32.totalorder %s1864_s27, 1 }
  0x16   : > { %s2298_s1 = scalar_select %p2008_p5, 1, 0 }
  0x17   : > { %s2299_s20 = scalar_select %p2012_p6, 1, 0 }
  0x18   : > { %p426_p8 = scmp.lt.s32.totalorder %s1864_s27, 3  ;;  %p2283_p9 = scmp.eq.s32.totalorder %s1991_s28, 0 }
  0x19   : > { %2300 = sst [smem:[#allocation21_spill]] %s2299_s20  ;;  %s1866_s22 = smov [#allocation5]  }
  0x1a   : > { %p2019_p10 = pnand %p1428_p7, %p426_p8  ;;  %s452_s23 = sshll.u32 %s1866_s22, 4  ;;  %s453_s23 = int_to_ptr.vmem [resolvable:$true] %s452_s23 }
  0x1b   : > { %s1867_s29 = smov [#allocation8]   ;;  %s1868_s19 = smov [#allocation2]  }
  0x1c   : > { %s2301_s21 = scalar_select %p2019_p10, 1, 0 }
  0x1d   : > { %p1586_p11 = pneg %p2019_p10  ;;  %s480_s30 = sshll.u32 %s1867_s29, 4  ;;  %s481_s30 = int_to_ptr.vmem [resolvable:$true] %s480_s30 }
  0x1e   : > { %s438_s26 = sshll.u32 %s1868_s19, 4  ;;  %s1673_s22 = scalar_lea.vmem %s453_s23, 16  ;;  %s2031_s26 = int_to_ptr.vmem [resolvable:$true] %s438_s26 }
  0x1f   : > { %p2027_p12 = pnand %p2283_p9, %p1586_p11  ;;  %p1674_p0 = scmp.ne.s32.totalorder %s453_s23, %s1673_s22 }
  0x20   : > { %s1680_s29 = scalar_lea.vmem %s453_s23, 32  ;;  %p1681_p3 = scmp.lt.s32.totalorder %s453_s23, %s453_s23 }
  0x21   : > { %p2035_p13 = pneg %p2027_p12  ;;  %p1682_p4 = scmp.lt.s32.totalorder %s1680_s29, %s1673_s22 }
  0x23   : > { %p1676_p1 = pnand %p1674_p0, %p2035_p13  ;;  %p1683_p7 = por %p1682_p4, %p1681_p3 }
  0x25   : > { %p1677_p2 = pneg %p1676_p1 }
  0x27   : > { %p1684_p8 = pnand %p1683_p7, %p1677_p2 }
  0x29   : > { %1687 = shalt.err (!%p1684_p8)
}
  0x2a   : > { %s2304_s2 = sld [smem:[#allocation24_spill]]  ;;  %s1699_s24 = scalar_lea.vmem %s481_s30, 16 }
  0x2b   : > { %p1700_p11 = scmp.ne.s32.totalorder %s481_s30, %s1699_s24  ;;  %s1706_s27 = scalar_lea.vmem %s481_s30, 32 }
  0x2c   : > { %p1707_p0 = scmp.lt.s32.totalorder %s481_s30, %s481_s30  ;;  %p1708_p1 = scmp.lt.s32.totalorder %s1706_s27, %s1699_s24 }
  0x2d   : > { %p1702_p9 = pnand %p1700_p11, %p2035_p13 }
  0x2e   : > { %p1709_p5 = por %p1708_p1, %p1707_p0 }
  0x2f   : > { %p1703_p6 = pneg %p1702_p9 }
  0x30   : > { %1592 = dma.hbm_to_vmem [thread:$0]  (!%p2027_p12), %s2304_s2, 16, %s453_s23, [#allocation6]  }
  0x31   : > { %p1710_p10 = pnand %p1709_p5, %p1703_p6 }
  0x33   : > { %1713 = shalt.err (!%p1710_p10)
}
  0x34   : > { %s2305_s6 = sld [smem:[#allocation25_spill]]  ;;  %s1725_s20 = scalar_lea.vmem %s2031_s26, 256 }
  0x35   : > { %p1726_p2 = scmp.ne.s32.totalorder %s2031_s26, %s1725_s20  ;;  %p1733_p4 = scmp.lt.s32.totalorder %s2031_s26, %s2031_s26 }
  0x36   : > { %p1734_p7 = scmp.lt.s32.totalorder %s1725_s20, %s1725_s20 }
  0x37   : > { %p1728_p9 = pnand %p1726_p2, %p2035_p13 }
  0x38   : > { %p1735_p5 = por %p1734_p7, %p1733_p4 }
  0x39   : > { %p1729_p3 = pneg %p1728_p9 }
  0x3a   : > { %1598 = dma.hbm_to_vmem [thread:$0]  (!%p2027_p12), %s2305_s6, 16, %s481_s30, [#allocation9]  }
  0x3b   : > { %p1736_p6 = pnand %p1735_p5, %p1729_p3 }
  0x3d   : > { %1739 = shalt.err (!%p1736_p6)
}
  0x3e   : > { %s1869_s24 = smov 128   ;;  %s1870_s27 = smov 8  }
  0x3f   : > { %s2306_s30 = sld [smem:[#allocation23_spill]]  ;;  %s1871_s22 = smov [#allocation7]  }
  0x40   : > { %s466_s29 = sshll.u32 %s1871_s22, 4  ;;  %s1872_s2 = smov [#allocation10]   ;;  %s467_s29 = int_to_ptr.vmem [resolvable:$true] %s466_s29 }
  0x41   : > { %s494_s6 = sshll.u32 %s1872_s2, 4  ;;  %s1751_s17 = scalar_lea.vmem %s467_s29, 16  ;;  %s495_s6 = int_to_ptr.vmem [resolvable:$true] %s494_s6 }
  0x42   : > { %p1752_p10 = scmp.ne.s32.totalorder %s467_s29, %s1751_s17  ;;  %s1758_s20 = scalar_lea.vmem %s467_s29, 32 }
  0x43   : > { %p1759_p0 = scmp.lt.s32.totalorder %s467_s29, %s467_s29  ;;  %p1760_p1 = scmp.lt.s32.totalorder %s1758_s20, %s1751_s17 }
  0x44   : > { %p1754_p8 = pnand %p1752_p10, %p2035_p13 }
  0x45   : > { %1589 = dma.hbm_to_vmem [thread:$0]  (!%p2027_p12), %s2306_s30, 256, %s2031_s26, [#allocation3], %s1869_s24, %s1869_s24, %s1870_s27  }
  0x46   : > { %p1755_p11 = pneg %p1754_p8  ;;  %p1761_p2 = por %p1760_p1, %p1759_p0 }
  0x48   : > { %p1762_p9 = pnand %p1761_p2, %p1755_p11 }
  0x4a   : > { %1765 = shalt.err (!%p1762_p9)
}
  0x4b   : > { %1595 = dma.hbm_to_vmem [thread:$0]  (!%p2027_p12), %s2264_s4, 16, %s467_s29, [#allocation6]  }
  0x4c   : > { %s1777_s2 = scalar_lea.vmem %s495_s6, 16  ;;  %s1784_s24 = scalar_lea.vmem %s495_s6, 32 }
  0x4d   : > { %p1778_p3 = scmp.ne.s32.totalorder %s495_s6, %s1777_s2  ;;  %p1785_p5 = scmp.lt.s32.totalorder %s495_s6, %s495_s6 }
  0x4e   : > { %p1786_p6 = scmp.lt.s32.totalorder %s1784_s24, %s1777_s2 }
  0x4f   : > { %p1780_p4 = pnand %p1778_p3, %p2035_p13 }
  0x50   : > { %p1787_p10 = por %p1786_p6, %p1785_p5 }
  0x51   : > { %p1781_p7 = pneg %p1780_p4 }
  0x53   : > { %p1788_p8 = pnand %p1787_p10, %p1781_p7 }
  0x55   : > { %1791 = shalt.err (!%p1788_p8)
}
  0x56   : > { %1601 = dma.hbm_to_vmem [thread:$0]  (!%p2027_p12), %s2268_s8, 16, %s495_s6, [#allocation9]  }
  0x57   : > { %p2307_p11 = scmp.ne.s32.totalorder %s2301_s21, 0 }
  0x58   : > { %p2308_p0 = scmp.eq.s32.totalorder (!%p2307_p11), %s1991_s28, 0 }
  0x59   : > { %538 = sbr.rel (%p2307_p11) target bundleno = 1699 (0x6a3), region = 88 }
  0x5e   : > { %1835 = dma.done.wait (%p2308_p0), [#allocation3], 256   ;;  %p2309_p13 = pmov %p2308_p0 }
  0x5f   : > { %p2310_p1 = pmov %p2308_p0 }
  0x60   : > { %1837 = vsyncadd (%p2309_p13), [#allocation3], 4294967040 }
  0x61   : > { %1839 = dma.done.wait (%p2310_p1), [#allocation6], 32   ;;  %p2311_p2 = pmov %p2308_p0 }
  0x62   : > { %p2312_p9 = pmov %p2308_p0 }
  0x63   : > { %1841 = vsyncadd (%p2311_p2), [#allocation6], 4294967264 }
  0x64   : > { %1843 = dma.done.wait (%p2312_p9), [#allocation9], 32   ;;  %p2313_p12 = pmov %p2308_p0 }
  0x65   : > { %p605_p3 = scmp.lt.s32.totalorder %s1991_s28, 1  ;;  %v1873_v0 = vmov 0.0   ;;  %vm1874_vm0 = vmmov 0   ;;  %s2314_s19 = sld [smem:[#allocation22_spill]]  ;;  %v611_v1 = vld [vmem:[#allocation2 + $0x8] sm:$0xff]  ;;  %v610_v2 = vld [vmem:[#allocation2] sm:$0xff] }
  0x66   : > { %1845 = vsyncadd (%p2313_p12), [#allocation9], 4294967264  ;;  %1494 = vmatprep.subr.mxu0 %v1873_v0  ;;  %1498 = vmatprep.mubr.msk.f32.mxu0 %vm1874_vm0, %v1873_v0  ;;  %vm619_vm1 = vcmask 130048   ;;  %v697_v4 = vld [vmem:[%s2263_s3 + $0x18] sm:$0xff]  ;;  %v696_v5 = vld [vmem:[%s2263_s3 + $0x10] sm:$0xff]  ;;  %vm705_vm2 = vcmask 261120  }
  0x67   : > { %s606_s6 = scalar_select %p605_p3, %s1991_s28, 1  ;;  %1501 = vmatprep.subr.mxu1 %v1873_v0  ;;  %1509 = vmatprep.mubr.msk.f32.mxu1 %vm1874_vm0, %v1873_v0  ;;  %v695_v6 = vld [vmem:[%s2263_s3 + $0x8] sm:$0xff]  ;;  %v694_v7 = vld [vmem:[%s2263_s3] sm:$0xff]  ;;  %v783_v8 = vld [vmem:[%s2265_s5 + $0x18] sm:$0xff]  ;;  %vm955_vm3 = vcmask 64512   ;;  %vm1295_vm4 = vcmask 392192  }
  0x68   : > { %1495 = vmatpush3.msra.mxu0 %v611_v1  ;;  %1502 = vmatpush3.msra.mxu1 %v697_v4  ;;  %v1443_v9 = vld [vmem:[#allocation5] ss:$0 sm:$0xff]  ;;  %v781_v15 = vld [vmem:[%s2265_s5 + $0x8] sm:$0xff]  ;;  %v780_v16 = vld [vmem:[%s2265_s5] sm:$0xff]  ;;  %s1876_s20 = smov 48   ;;  %s602_s17 = sand.u32 1, %s1856_s25  }
  0x69   : > { %s1442_s0 = sshll.u32 %s606_s6, 3  ;;  %1496 = vmatprep.subr.mxu0 %v1873_v0  ;;  %1503 = vmatprep.subr.mxu1 %v1873_v0  ;;  %v782_v14 = vld [vmem:[%s2265_s5 + $0x10] sm:$0xff]  ;;  %v866_v22 = vld [vmem:[%s2267_s7 + $0x8] sm:$0xff]  ;;  %v865_v23 = vld [vmem:[%s2267_s7] sm:$0xff]  ;;  %s1877_s6 = smov 80   ;;  %vm1297_vm5 = vcmask 654336  }
  0x6a   : > { %1497 = vmatpush3.msra.mxu0 %v610_v2  ;;  %1504 = vmatpush3.msra.mxu1 %v696_v5  ;;  %v1445_v17 = vld [vmem:[#allocation7] ss:$0 sm:$0xff]  ;;  %v947_v24 = vld [vmem:[%s2269_s9] sm:$0xff]  ;;  %v1447_v25 = vld [vmem:[#allocation8] ss:$0 sm:$0xff]  ;;  %s1441_s27 = sshll.u32 %s602_s17, 3 }
  0x6b   : > { %s608_s30 = scalar_lea.vmem %s2314_s19, %s1442_s0  ;;  %1512 = vmatprep.subr.mxu0 %v1873_v0  ;;  %1505 = vmatprep.subr.mxu1 %v1873_v0  ;;  %s1875_s0 = smov 16   ;;  %v1449_v30 = vld [vmem:[#allocation10] ss:$0 sm:$0xff]  ;;  %v1031_v34 = vld [vmem:[%s2271_s11 + $0x8] sm:$0xff]  ;;  %v1030_v35 = vld [vmem:[%s2271_s11] sm:$0xff]  ;;  %vm1299_vm6 = vcmask 785408  }
  0x6c   : > { %v609_v3 = vld [vmem:[%s608_s30] sm:$0xff]  ;;  %1506 = vmatpush3.msra.mxu1 %v695_v6  ;;  %v1116_v36 = vld [vmem:[%s2273_s13 + $0x18] sm:$0xff]  ;;  %v1115_v42 = vld [vmem:[%s2273_s13 + $0x10] sm:$0xff]  ;;  %s1460_s21 = sshll.u32 %s1991_s28, 7  ;;  %s604_s18 = scalar_lea.vmem [#allocation11], %s1441_s27  ;;  %vm1301_vm7 = vcmask 850944  }
  0x6d   : > { %1499 = vmatmul.mubr.msk.f32.vlgmr.msra.gmra.mxu0 %vm619_vm1, %v609_v3  ;;  %1507 = vmatprep.subr.mxu1 %v1873_v0  ;;  %v1451_v37 = vld [vmem:[%s2270_s10] ss:$0 sm:$0xff]  ;;  %v1114_v43 = vld [vmem:[%s2273_s13 + $0x8] sm:$0xff]  ;;  %v1201_v45 = vld [vmem:[%s2275_s15 + $0x18] sm:$0xff]  ;;  %s1318_s19 = sshll.u32 %s604_s18, 4  ;;  %s2315_s29 = sld [smem:[#allocation26_spill]]  ;;  %s1319_s19 = int_to_ptr.vmem [resolvable:$true] %s1318_s19 }
  0x6e   : > { %1520 = vmatprep.mubr.msk.f32.mxu0 %vm1874_vm0, %v1873_v0  ;;  %1508 = vmatpush3.msra.mxu1 %v694_v7  ;;  %v1113_v44 = vld [vmem:[%s2273_s13] sm:$0xff]  ;;  %v1200_v51 = vld [vmem:[%s2275_s15 + $0x10] sm:$0xff]  ;;  %v1199_v52 = vld [vmem:[%s2275_s15 + $0x8] sm:$0xff]  ;;  %s1305_s23 = scalar_lea.sflag [#allocation4], %s602_s17  ;;  %s1792_s26 = scalar_lea.vmem %s1319_s19, 128 }
  0x6f   : > { %1523 = vmatprep.subr.mxu1 %v1873_v0  ;;  %1513 = vmatpush3.msra.mxu0 %v783_v8  ;;  %v1453_v46 = vld [vmem:[%s2272_s12] ss:$0 sm:$0xff]  ;;  %p1793_p4 = scmp.ne.s32.totalorder %s1319_s19, %s1792_s26  ;;  %p2316_p7 = scmp.ne.s32.totalorder %s2298_s1, 0 }
  0x70   : > { %1514 = vmatprep.subr.mxu0 %v1873_v0  ;;  %v1198_v53 = vld [vmem:[%s2275_s15] sm:$0xff]  ;;  %s1879_s28 = smov [#allocation11]  }
  0x71   : > { %1515 = vmatpush3.msra.mxu0 %v782_v14  ;;  %v1455_v54 = vld [vmem:[%s2274_s14] ss:$0 sm:$0xff]  ;;  %p1794_p5 = pnand %p1793_p4, %p2316_p7  ;;  %s1796_s2 = sshll.u32 %s1879_s28, 4  ;;  %s1797_s2 = int_to_ptr.vmem [resolvable:$false] %s1796_s2 }
  0x72   : > { %1516 = vmatprep.subr.mxu0 %v1873_v0  ;;  %v1457_v59 = vld [vmem:[%s2276_s16] ss:$0 sm:$0xff]  ;;  %s1798_s24 = scalar_lea.vmem %s1797_s2, 256  ;;  %p1799_p10 = scmp.lt.s32.totalorder %s1319_s19, %s1797_s2 }
  0x73   : > { %1517 = vmatpush3.msra.mxu0 %v781_v15  ;;  %p1795_p6 = pneg %p1794_p5  ;;  %p1800_p8 = scmp.lt.s32.totalorder %s1798_s24, %s1792_s26 }
  0x74   : > { %1518 = vmatprep.subr.mxu0 %v1873_v0 }
  0x75   : > { %1519 = vmatpush3.msra.mxu0 %v780_v16  ;;  %p1801_p11 = por %p1800_p8, %p1799_p10 }
  0x76   : > { %1530 = vmatprep.subr.mxu0 %v1873_v0 }
  0x77   : > { %p1802_p0 = pnand %p1801_p11, %p1795_p6 }
 0x12d   : > { %v689_v10 = vpop.f32.mrf.mxu0 }
 0x12e   : > { %v690_v11 = vadd.f32 %v1443_v9, %v689_v10 }
 0x12f   : > { %v1500_v12 = vpop.f32.mrf.mxu0 }
 0x130   : > { %v693_v13 = vmax.f32 %v690_v11, 0.0 }
 0x132   : > { %1282 = vrot.lane.b32.xlu0 %v693_v13, %s1875_s0  ;;  %1510 = vmatmul.mubr.msk.f32.vlgmr.msra.gmra.mxu1 %vm705_vm2, %v693_v13  ;;  %s1878_s0 = smov 96  }
 0x133   : > { %1527 = vmatprep.mubr.msk.f32.mxu1 %vm1874_vm0, %v1873_v0  ;;  %1524 = vmatpush3.msra.mxu1 %v866_v22 }
 0x134   : > { %1525 = vmatprep.subr.mxu1 %v1873_v0 }
 0x135   : > { %1526 = vmatpush3.msra.mxu1 %v865_v23 }
 0x136   : > { %1535 = vmatprep.subr.mxu1 %v1873_v0 }
 0x1a4   : > { %v1283_v60 = vpop.permute.xlu0 %1282 }
 0x1f2   : > { %v775_v18 = vpop.f32.mrf.mxu1 }
 0x1f3   : > { %v776_v19 = vadd.f32 %v1445_v17, %v775_v18 }
 0x1f4   : > { %v1511_v20 = vpop.f32.mrf.mxu1 }
 0x1f5   : > { %v779_v21 = vmax.f32 %v776_v19, 0.0 }
 0x1f7   : > { %1285 = vrot.lane.b32.xlu0 %v779_v21, %s1876_s20  ;;  %1521 = vmatmul.mubr.msk.f32.vlgmr.msra.gmra.mxu0 %vm705_vm2, %v779_v21  ;;  %s2225_s20 = scalar_lea.hbm %s2315_s29, %s1460_s21 }
 0x1f8   : > { %1532 = vmatprep.mubr.msk.f32.mxu0 %vm1874_vm0, %v1873_v0  ;;  %1531 = vmatpush3.msra.mxu0 %v947_v24 }
 0x1f9   : > { %1542 = vmatprep.subr.mxu0 %v1873_v0 }
 0x269   : > { %v1286_v1 = vpop.permute.xlu0 %1285 }
 0x2b7   : > { %v860_v26 = vpop.f32.mrf.mxu0 }
 0x2b8   : > { %v861_v27 = vadd.f32 %v1447_v25, %v860_v26 }
 0x2b9   : > { %v1522_v28 = vpop.f32.mrf.mxu0 }
 0x2ba   : > { %v864_v29 = vmax.f32 %v861_v27, 0.0 }
 0x2bc   : > { %1288 = vrot.lane.b32.xlu1 %v864_v29, %s1877_s6  ;;  %1528 = vmatmul.mubr.msk.f32.vlgmr.msra.gmra.mxu1 %vm619_vm1, %v864_v29 }
 0x2bd   : > { %1539 = vmatprep.mubr.msk.f32.mxu1 %vm1874_vm0, %v1873_v0  ;;  %1536 = vmatpush3.msra.mxu1 %v1031_v34 }
 0x2be   : > { %1537 = vmatprep.subr.mxu1 %v1873_v0 }
 0x2bf   : > { %1538 = vmatpush3.msra.mxu1 %v1030_v35 }
 0x2c0   : > { %1553 = vmatprep.subr.mxu1 %v1873_v0 }
 0x32e   : > { %v1289_v62 = vpop.permute.xlu1 %1288 }
 0x37c   : > { %v943_v31 = vpop.f32.mrf.mxu1 }
 0x37d   : > { %v944_v32 = vadd.f32 %v1449_v30, %v943_v31 }
 0x37e   : > { %v1529_v33 = vpop.f32.mrf.mxu1 }
 0x37f   : > { %1291 = vrot.lane.b32.xlu1 %v944_v32, %s1878_s0  ;;  %1533 = vmatmul.mubr.msk.f32.vlgmr.msra.gmra.mxu0 %vm955_vm3, %v944_v32 }
 0x380   : > { %1550 = vmatprep.mubr.msk.f32.mxu0 %vm1874_vm0, %v1873_v0  ;;  %1543 = vmatpush3.msra.mxu0 %v1116_v36 }
 0x381   : > { %1544 = vmatprep.subr.mxu0 %v1873_v0 }
 0x382   : > { %1545 = vmatpush3.msra.mxu0 %v1115_v42 }
 0x383   : > { %1546 = vmatprep.subr.mxu0 %v1873_v0 }
 0x384   : > { %1547 = vmatpush3.msra.mxu0 %v1114_v43 }
 0x385   : > { %1548 = vmatprep.subr.mxu0 %v1873_v0 }
 0x386   : > { %1549 = vmatpush3.msra.mxu0 %v1113_v44 }
 0x3f1   : > { %v1292_v4 = vpop.permute.xlu1 %1291 }
 0x43f   : > { %v1025_v38 = vpop.f32.mrf.mxu0 }
 0x440   : > { %v1026_v39 = vadd.f32 %v1451_v37, %v1025_v38 }
 0x441   : > { %v1534_v40 = vpop.f32.mrf.mxu0 }
 0x442   : > { %v1029_v41 = vmax.f32 %v1026_v39, 0.0 }
 0x444   : > { %1540 = vmatmul.mubr.msk.f32.vlgmr.msra.gmra.mxu1 %vm619_vm1, %v1029_v41 }
 0x445   : > { %1561 = vmatprep.mubr.msk.f32.mxu1 %vm1874_vm0, %v1873_v0  ;;  %1554 = vmatpush3.msra.mxu1 %v1201_v45 }
 0x446   : > { %1555 = vmatprep.subr.mxu1 %v1873_v0 }
 0x447   : > { %1556 = vmatpush3.msra.mxu1 %v1200_v51 }
 0x448   : > { %1557 = vmatprep.subr.mxu1 %v1873_v0 }
 0x449   : > { %1558 = vmatpush3.msra.mxu1 %v1199_v52 }
 0x44a   : > { %1559 = vmatprep.subr.mxu1 %v1873_v0 }
 0x44b   : > { %1560 = vmatpush3.msra.mxu1 %v1198_v53 }
 0x504   : > { %v1108_v47 = vpop.f32.mrf.mxu1 }
 0x505   : > { %v1109_v48 = vadd.f32 %v1453_v46, %v1108_v47 }
 0x506   : > { %v1541_v49 = vpop.f32.mrf.mxu1 }
 0x507   : > { %v1112_v50 = vmax.f32 %v1109_v48, 0.0 }
 0x509   : > { %1551 = vmatmul.mubr.msk.f32.vlgmr.msra.gmra.mxu0 %vm705_vm2, %v1112_v50 }
 0x5c9   : > { %v1193_v55 = vpop.f32.mrf.mxu0 }
 0x5ca   : > { %v1194_v56 = vadd.f32 %v1455_v54, %v1193_v55 }
 0x5cb   : > { %v1552_v57 = vpop.f32.mrf.mxu0 }
 0x5cc   : > { %v1197_v58 = vmax.f32 %v1194_v56, 0.0 }
 0x5ce   : > { %1562 = vmatmul.mubr.msk.f32.vlgmr.msra.gmra.mxu1 %vm705_vm2, %v1197_v58 }
 0x68e   : > { %v1278_v61 = vpop.f32.mrf.mxu1 }
 0x68f   : > { %v1279_v63 = vadd.f32 %v1457_v59, %v1278_v61 }
 0x690   : > { %v1563_v0 = vpop.f32.mrf.mxu1 }
 0x691   : > { %v1294_v2 = vsel %vm619_vm1, %v1279_v63, %v1283_v60 }
 0x692   : > { %v1296_v3 = vsel %vm1295_vm4, %v1294_v2, %v1286_v1 }
 0x693   : > { %v1298_v5 = vsel %vm1297_vm5, %v1296_v3, %v1289_v62 }
 0x694   : > { %v1300_v6 = vsel %vm1299_vm6, %v1298_v5, %v1292_v4 }
 0x695   : > { %v1302_v7 = vsel %vm1301_vm7, %v1300_v6, 0.0 }
 0x696   : > { %1303 = vst [vmem:[%s604_s18] sm:$0xff] %v1302_v7 }
 0x697   : > { %1805 = shalt.err (!%p1802_p0)
}
 0x698   : > { %s1806_s27 = scalar_lea.hbm %s2225_s20, 128  ;;  %s1810_s0 = scalar_lea.hbm %s2315_s29, 256 }
 0x699   : > { %p1807_p13 = scmp.ne.s32.totalorder %s2225_s20, %s1806_s27  ;;  %p1811_p9 = scmp.lt.s32.totalorder %s2225_s20, %s2315_s29 }
 0x69a   : > { %p1812_p12 = scmp.lt.s32.totalorder %s1810_s0, %s1806_s27 }
 0x69b   : > { %p1808_p1 = pnand %p1807_p13, %p2316_p7 }
 0x69c   : > { %p1813_p3 = por %p1812_p12, %p1811_p9 }
 0x69d   : > { %p1809_p2 = pneg %p1808_p1 }
 0x69f   : > { %p1814_p4 = pnand %p1813_p3, %p1809_p2 }
 0x6a1   : > { %1817 = shalt.err (!%p1814_p4)
}
 0x6a2   : > { %1584 = dma.vmem_to_hbm [thread:$0]  (%p2316_p7), %s1319_s19, 128, %s2225_s20, %s1305_s23  }
 0x6a3 PF: > { %s2317_s30 = sld [smem:[#allocation18_spill]] }
 0x6a4   : > { %s2318_s22 = sld [smem:[#allocation16_spill]] }
 0x6a5   : > { %s2319_s26 = sld [smem:[#allocation21_spill]] }
 0x6a9   : > { %p1616_p5 = scmp.ge.s32.totalorder %s2317_s30, 2 }
 0x6aa   : > { %s1330_s28 = sand.u32 1, %s2318_s22  }
 0x6ab   : > { %p2320_p6 = scmp.ne.s32.totalorder %s2319_s26, 0  ;;  %s1331_s2 = scalar_lea.sflag [#allocation4], %s1330_s28 }
 0x6ad   : > { %p1603_p10 = pnand %p1616_p5, %p2320_p6 }
 0x6af   : > { %p1604_p8 = pneg %p1603_p10 }
 0x6b1   : > { %1847 = dma.done.wait (%p1604_p8), %s1331_s2, 128  }
 0x6b2   : > { %1849 = vsyncadd (%p1604_p8), %s1331_s2, 4294967168  ;;  %s2321_s27 = sld [smem:[#allocation19_spill]]  ;;  %s2324_s24 = smov %s1856_s25 }
 0x6b3   : > { %s2322_s17 = sld [smem:[#allocation17_spill]] }
 0x6b4   : > { %s2323_s26 = sld [smem:[#allocation20_spill]] }
 0x6b8   : > { %p30_p11 = scmp.ge.s32.totalorder %s2321_s27, 4  }
 0x6b9   : > { %s2325_s25 = smov %s2322_s17 }
 0x6ba   :  { %32 = sbr.rel (!%p30_p11) target bundleno = 12 (0xc), region = 144 }
 0x6bf   :  { %1336 = vsyncpa [#allocation3], 1 }
 0x6c0   :  { %1338 = vsyncpa [#allocation3 + $0x1], 1 }
 0x6c1   :  { %1339 = vsyncpa [#allocation6], 1 }
 0x6c2   :  { %1340 = vsyncpa [#allocation9], 1 }
 0x6c3   :  { %1341 = vsyncpa [#allocation4], 1 }
 0x6c4   :  { %1343 = vsyncpa [#allocation4 + $0x1], 1 }

</bundles_post_ra>
